<compile_context>
chip_gen: v6e
topology: v6e:2x2x1
jax: 0.10.0
libtpu: 0.0.40
codegen_flags: <defaults>
</compile_context>

<pallas_src>
import math
import numpy as np
import jax
import jax.numpy as jnp
from jax import lax
from jax.experimental import pallas as pl
from jax.experimental.pallas import tpu as pltpu

LN_EPS = 1e-5  # PyTorch nn.LayerNorm default


def _round_up(x, m):
    return (x + m - 1) // m * m


# ----------------------------- kernel helpers -------------------------------

def _layernorm(x, gamma, beta):
    mu = jnp.mean(x, axis=-1, keepdims=True)
    var = jnp.mean((x - mu) ** 2, axis=-1, keepdims=True)
    return (x - mu) * lax.rsqrt(var + LN_EPS) * gamma + beta


def _gelu(x):
    # tanh approximation of GELU (PyTorch nn.GELU default is exact erf;
    # ~1e-3 relative deviation).  Lowers cleanly on VPU/EUP.
    c = 0.7978845608028654  # sqrt(2/pi)
    return 0.5 * x * (1.0 + jnp.tanh(c * (x + 0.044715 * x * x * x)))


# ------------------------------ fused kernel ---------------------------------

def make_fused_kernel(layout):
    """layout[s]: dict name -> (row0, rows, cols) for weight matrices,
                               (row, cols)        for 1-D vectors (python ints)."""

    def kernel(x_ref, pe_ref, vpack_ref, wpack_ref, o_ref, mrg_ref):
        # static ref-slice accessors (zero-cost views, aligned offsets)
        def W(s, name):
            r0, r, c = layout[s][name]
            return wpack_ref[r0:r0 + r, 0:c]           # bf16 weight slice

        def V(s, name):
            i, c = layout[s][name]
            return vpack_ref[i:i + 1, 0:c]             # f32 (1, c) broadcasts over rows

        def mm(a_f32, w_bf16):
            # MXU matmul: bf16 operands, f32 accumulation.
            return jnp.dot(a_f32.astype(jnp.bfloat16), w_bf16,
                           preferred_element_type=jnp.float32)

        def block(x, s):
            # single-head attention (shared K/V projection) + post-LN FFN block.
            d = layout[s]["wo"][2]
            # fused Q/KV projection; 1/sqrt(d) already folded into the Q half.
            qk = mm(x, W(s, "wqkv")) + V(s, "bqkv")     # (l, 2d) f32
            q16 = qk[:, 0:d].astype(jnp.bfloat16)
            k16 = qk[:, d:2 * d].astype(jnp.bfloat16)   # v == k (same kv_projection)
            # scores = q @ k^T without explicit transpose (contract last dims)
            scores = lax.dot_general(q16, k16, (((1,), (1,)), ((), ())),
                                     preferred_element_type=jnp.float32)
            m = jnp.max(scores, axis=-1, keepdims=True)
            e = jnp.exp(scores - m)
            attn = e * pl.reciprocal(jnp.sum(e, axis=-1, keepdims=True), approx=True)
            ao = jnp.dot(attn.astype(jnp.bfloat16), k16,
                         preferred_element_type=jnp.float32)
            ao = mm(ao, W(s, "wo")) + V(s, "bo")
            y = _layernorm(x + ao, V(s, "g1"), V(s, "be1"))
            h = _gelu(mm(y, W(s, "w1")) + V(s, "b1"))
            h = mm(h, W(s, "w2")) + V(s, "b2")
            return _layernorm(y + h, V(s, "g2"), V(s, "be2"))

        def merge_and_pre(x, s):
            # patch merge (l, c) -> (l//2, 2c) fused with the stage pre-linear.
            # Park x in VMEM scratch, read even/odd rows via stride-2 sublane
            # loads, and fold the lane-concat into the matmul:
            #   merged @ Wpre = even @ Wpre[:c] + odd @ Wpre[c:]
            lp, c = x.shape
            lh = lp // 2
            mrg_ref[0:lp, 0:c] = x
            even = mrg_ref[pl.ds(0, lh, stride=2), 0:c]   # rows 0,2,4,...
            odd = mrg_ref[pl.ds(1, lh, stride=2), 0:c]    # rows 1,3,5,...
            return (mm(even, W(s, "wpre_e"))
                    + mm(odd, W(s, "wpre_o"))
                    + V(s, "bpre"))

        x = x_ref[0]                                     # (L, C) f32

        # stage 1: token-embedding linear + sinusoidal PE, then attn/FFN block
        x = mm(x, W(0, "wpre")) + V(0, "bpre") + pe_ref[...]
        x = block(x, 0)                                  # (L, d/4)

        # stage 2: patch merge + linear_sec, then block
        x = block(merge_and_pre(x, 1), 1)                # (L/2, d/2)

        # stage 3: patch merge + linear_thir, then block
        x = block(merge_and_pre(x, 2), 2)                # (L/4, d)

        o_ref[0] = x

    return kernel


def patch_audio_forward(x, pe, wpack, vpack, layout, d_model):
    """x: (B, L, C) f32 with C == d_model // 4 and L % 4 == 0."""
    B, L, C = x.shape
    d_out = layout[2]["wo"][2]        # final d_model
    L_out = L // 4

    kernel = make_fused_kernel(layout)
    out = pl.pallas_call(
        kernel,
        grid=(B,),
        in_specs=[
            pl.BlockSpec((1, L, C), lambda b: (b, 0, 0)),        # x  (per-batch block)
            pl.BlockSpec(pe.shape, lambda b: (0, 0)),            # stage-1 positional emb
            pl.BlockSpec(vpack.shape, lambda b: (0, 0)),         # packed bias/LN vectors
            pl.BlockSpec(wpack.shape, lambda b: (0, 0)),         # packed bf16 weights
        ],
        out_specs=pl.BlockSpec((1, L_out, d_out), lambda b: (b, 0, 0)),
        out_shape=jax.ShapeDtypeStruct((B, L_out, d_out), jnp.float32),
        scratch_shapes=[pltpu.VMEM((L, d_model // 2), jnp.float32)],  # merge scratch
        compiler_params=pltpu.CompilerParams(dimension_semantics=("parallel",)),
    )(x, pe, vpack, wpack)
    return out


# ------------------------------ parameters ----------------------------------

def _init_linear(key, din, dout, scale=0.05):
    kw, kb = jax.random.split(key)
    w = jax.random.normal(kw, (din, dout), jnp.float32) * scale
    b = jax.random.normal(kb, (dout,), jnp.float32) * scale
    return w, b


def make_stage_params(key, d_in, d, f, split_pre):
    """One stage = pre-linear + Atten(d) + post-LN FFN(d->f->d).
    The 1/sqrt(d) attention scale is folded into the Q half of Wqkv/bqkv."""
    ks = jax.random.split(key, 6)
    wpre, bpre = _init_linear(ks[0], d_in, d)
    wq, bq = _init_linear(ks[1], d, d)
    wkv, bkv = _init_linear(ks[2], d, d)
    wo, bo = _init_linear(ks[3], d, d)
    w1, b1 = _init_linear(ks[4], d, f)
    w2, b2 = _init_linear(ks[5], f, d)
    scale = 1.0 / math.sqrt(d)

    weights = {}
    if split_pre:                       # stage fed by a patch merge: pre-split Wpre rows
        h = d_in // 2
        weights["wpre_e"] = wpre[:h]
        weights["wpre_o"] = wpre[h:]
    else:
        weights["wpre"] = wpre
    weights["wqkv"] = jnp.concatenate([wq * scale, wkv], axis=1)   # (d, 2d)
    weights["wo"] = wo
    weights["w1"] = w1
    weights["w2"] = w2

    vectors = dict(
        bpre=bpre,
        bqkv=jnp.concatenate([bq * scale, bkv], axis=0),           # (2d,)
        bo=bo,
        g1=jnp.ones((d,), jnp.float32), be1=jnp.zeros((d,), jnp.float32),
        b1=b1, b2=b2,
        g2=jnp.ones((d,), jnp.float32), be2=jnp.zeros((d,), jnp.float32),
    )
    return {"weights": weights, "vectors": vectors}


def pack_params(stage_params):
    """Pack all stage weight matrices into one bf16 (R, lanes) array (each
    block's rows padded to a multiple of 16 so every slice is sublane-aligned
    for bf16) and all 1-D vectors into one f32 (NV, lanes) array."""
    lanes = 128
    for p in stage_params:
        for w in p["weights"].values():
            lanes = max(lanes, w.shape[1])
        for v in p["vectors"].values():
            lanes = max(lanes, v.shape[0])
    lanes = _round_up(lanes, 128)

    w_blocks, v_rows, layout = [], [], []
    wr = 0
    for p in stage_params:
        st = {}
        for name, w in p["weights"].items():
            r, c = w.shape
            rp = _round_up(r, 16)                      # bf16 sublane tile alignment
            blk = jnp.zeros((rp, lanes), jnp.float32).at[:r, :c].set(w)
            w_blocks.append(blk.astype(jnp.bfloat16))
            st[name] = (wr, r, c)
            wr += rp
        for name, v in p["vectors"].items():
            c = v.shape[0]
            st[name] = (len(v_rows), c)
            v_rows.append(jnp.zeros((lanes,), jnp.float32).at[:c].set(v))
        layout.append(st)

    wpack = jnp.concatenate(w_blocks, axis=0)          # (R, lanes) bf16
    while len(v_rows) % 8 != 0:                        # pad sublane count to 8
        v_rows.append(jnp.zeros((lanes,), jnp.float32))
    vpack = jnp.stack(v_rows, axis=0)                  # (NV, lanes) f32
    return wpack, vpack, layout


def sinusoidal_pe(L, D):
    pos = np.arange(L, dtype=np.float64)[:, None]
    i = np.arange(D, dtype=np.float64)[None, :]
    angle = pos / np.power(10000.0, (2.0 * (i // 2)) / D)
    pe = np.where(i % 2 == 0, np.sin(angle), np.cos(angle))
    return jnp.asarray(pe, jnp.float32)                # (L, D)


# ---------------------------------- main -------------------------------------

if __name__ == "__main__":
    d_model = 32
    B, L = 2, 8
    C = d_model // 4                                   # x: (2, 8, 8)

    key = jax.random.PRNGKey(0)
    kx, k1, k2, k3 = jax.random.split(key, 4)
    x = jax.random.normal(kx, (B, L, C), jnp.float32)

    stage_params = [
        # stage 1: pre = DataEmbedding token linear (C->C), attn/FFN at d_model//4
        make_stage_params(k1, C, d_model // 4, d_model, split_pre=False),
        # stage 2: pre = linear_sec (d_model//2 -> d_model//2), FFN to d_model*2
        make_stage_params(k2, d_model // 2, d_model // 2, d_model * 2, split_pre=True),
        # stage 3: pre = linear_thir (d_model -> d_model), FFN to d_model*4
        make_stage_params(k3, d_model, d_model, d_model * 4, split_pre=True),
    ]
    wpack, vpack, layout = pack_params(stage_params)
    pe = sinusoidal_pe(L, C)

    out = patch_audio_forward(x, pe, wpack, vpack, layout, d_model)
    out = jax.block_until_ready(out)
    assert out.shape == (B, L // 4, d_model), out.shape
    assert bool(jnp.all(jnp.isfinite(out)))
    print("KERNEL_OK")
</pallas_src>

<mosaic_0001>
module attributes {stable_mosaic.version = 11 : i64} {
  func.func @kernel(%arg0: i32, %arg1: memref<1x8x8xf32, #tpu.memory_space<vmem>>, %arg2: memref<8x8xf32, #tpu.memory_space<vmem>>, %arg3: memref<32x128xf32, #tpu.memory_space<vmem>>, %arg4: memref<496x128xbf16, #tpu.memory_space<vmem>>, %arg5: memref<1x2x32xf32, #tpu.memory_space<vmem>>, %arg6: memref<8x16xf32, #tpu.memory_space<vmem>>) attributes {dimension_semantics = [#tpu.dimension_semantics<parallel>], iteration_bounds = array<i64: 2>, scalar_prefetch = 0 : i64, scratch_operands = 1 : i64, tpu.core_type = #tpu.core_type<tc>, window_params = [{transform_indices = @transform_0, window_bounds = array<i64: 1, 8, 8>}, {pipeline_mode = #tpu.pipeline_mode<synchronous>, transform_indices = @transform_1, window_bounds = array<i64: 8, 8>}, {pipeline_mode = #tpu.pipeline_mode<synchronous>, transform_indices = @transform_2, window_bounds = array<i64: 32, 128>}, {pipeline_mode = #tpu.pipeline_mode<synchronous>, transform_indices = @transform_3, window_bounds = array<i64: 496, 128>}, {transform_indices = @transform_4, window_bounds = array<i64: 1, 2, 32>}]} {
    %c0 = arith.constant 0 : index
    %c0_0 = arith.constant 0 : index
    %c0_1 = arith.constant 0 : index
    %0 = vector.load %arg1[%c0, %c0_0, %c0_1] : memref<1x8x8xf32, #tpu.memory_space<vmem>>, vector<1x8x8xf32>
    %1 = vector.shape_cast %0 : vector<1x8x8xf32> to vector<8x8xf32>
    %c0_2 = arith.constant 0 : index
    %c0_3 = arith.constant 0 : index
    %2 = vector.load %arg4[%c0_2, %c0_3] : memref<496x128xbf16, #tpu.memory_space<vmem>>, vector<8x8xbf16>
    %3 = arith.truncf %1 : vector<8x8xf32> to vector<8x8xbf16>
    %cst = arith.constant dense<0.000000e+00> : vector<8x8xf32>
    %4 = tpu.matmul %3, %2, %cst {dimension_numbers = #tpu.dot_dimension_numbers<[1], [0], [0], [1], [0, 0, 1, 1], [], []>} : vector<8x8xbf16>, vector<8x8xbf16>, vector<8x8xf32> -> vector<8x8xf32>
    %c0_4 = arith.constant 0 : index
    %c0_5 = arith.constant 0 : index
    %5 = vector.load %arg3[%c0_4, %c0_5] : memref<32x128xf32, #tpu.memory_space<vmem>>, vector<1x8xf32>
    %6 = vector.broadcast %5 : vector<1x8xf32> to vector<8x8xf32>
    %7 = arith.addf %4, %6 : vector<8x8xf32>
    %c0_6 = arith.constant 0 : index
    %c0_7 = arith.constant 0 : index
    %8 = vector.load %arg2[%c0_6, %c0_7] : memref<8x8xf32, #tpu.memory_space<vmem>>, vector<8x8xf32>
    %9 = arith.addf %7, %8 : vector<8x8xf32>
    %c16 = arith.constant 16 : index
    %c0_8 = arith.constant 0 : index
    %10 = vector.load %arg4[%c16, %c0_8] : memref<496x128xbf16, #tpu.memory_space<vmem>>, vector<8x16xbf16>
    %11 = arith.truncf %9 : vector<8x8xf32> to vector<8x8xbf16>
    %cst_9 = arith.constant dense<0.000000e+00> : vector<8x16xf32>
    %12 = tpu.matmul %11, %10, %cst_9 {dimension_numbers = #tpu.dot_dimension_numbers<[1], [0], [0], [1], [0, 0, 1, 1], [], []>} : vector<8x8xbf16>, vector<8x16xbf16>, vector<8x16xf32> -> vector<8x16xf32>
    %c1 = arith.constant 1 : index
    %c0_10 = arith.constant 0 : index
    %13 = vector.load %arg3[%c1, %c0_10] : memref<32x128xf32, #tpu.memory_space<vmem>>, vector<1x16xf32>
    %14 = vector.broadcast %13 : vector<1x16xf32> to vector<8x16xf32>
    %15 = arith.addf %12, %14 : vector<8x16xf32>
    %16 = vector.extract_strided_slice %15 {offsets = [0, 0], sizes = [8, 8], strides = [1, 1]} : vector<8x16xf32> to vector<8x8xf32>
    %17 = arith.truncf %16 : vector<8x8xf32> to vector<8x8xbf16>
    %18 = vector.extract_strided_slice %15 {offsets = [0, 8], sizes = [8, 8], strides = [1, 1]} : vector<8x16xf32> to vector<8x8xf32>
    %19 = arith.truncf %18 : vector<8x8xf32> to vector<8x8xbf16>
    %cst_11 = arith.constant dense<0.000000e+00> : vector<8x8xf32>
    %20 = tpu.matmul %17, %19, %cst_11 {dimension_numbers = #tpu.dot_dimension_numbers<[1], [1], [0], [0], [0, 0, 1, 0], [], []>} : vector<8x8xbf16>, vector<8x8xbf16>, vector<8x8xf32> -> vector<8x8xf32>
    %cst_12 = arith.constant dense<0xFF800000> : vector<8xf32>
    %21 = vector.multi_reduction <maximumf>, %20, %cst_12 [1] : vector<8x8xf32> to vector<8xf32>
    %22 = vector.shape_cast %21 : vector<8xf32> to vector<8x1xf32>
    %23 = vector.broadcast %22 : vector<8x1xf32> to vector<8x8xf32>
    %24 = arith.subf %20, %23 : vector<8x8xf32>
    %25 = math.exp %24 : vector<8x8xf32>
    %cst_13 = arith.constant dense<0.000000e+00> : vector<8xf32>
    %26 = vector.multi_reduction <add>, %25, %cst_13 [1] : vector<8x8xf32> to vector<8xf32>
    %27 = vector.shape_cast %26 : vector<8xf32> to vector<8x1xf32>
    %28 = tpu.reciprocal %27 {approx = true} : vector<8x1xf32> -> vector<8x1xf32>
    %29 = vector.broadcast %28 : vector<8x1xf32> to vector<8x8xf32>
    %30 = arith.mulf %25, %29 : vector<8x8xf32>
    %31 = arith.truncf %30 : vector<8x8xf32> to vector<8x8xbf16>
    %cst_14 = arith.constant dense<0.000000e+00> : vector<8x8xf32>
    %32 = tpu.matmul %31, %19, %cst_14 {dimension_numbers = #tpu.dot_dimension_numbers<[1], [0], [0], [1], [0, 0, 1, 1], [], []>} : vector<8x8xbf16>, vector<8x8xbf16>, vector<8x8xf32> -> vector<8x8xf32>
    %c32 = arith.constant 32 : index
    %c0_15 = arith.constant 0 : index
    %33 = vector.load %arg4[%c32, %c0_15] : memref<496x128xbf16, #tpu.memory_space<vmem>>, vector<8x8xbf16>
    %34 = arith.truncf %32 : vector<8x8xf32> to vector<8x8xbf16>
    %cst_16 = arith.constant dense<0.000000e+00> : vector<8x8xf32>
    %35 = tpu.matmul %34, %33, %cst_16 {dimension_numbers = #tpu.dot_dimension_numbers<[1], [0], [0], [1], [0, 0, 1, 1], [], []>} : vector<8x8xbf16>, vector<8x8xbf16>, vector<8x8xf32> -> vector<8x8xf32>
    %c2 = arith.constant 2 : index
    %c0_17 = arith.constant 0 : index
    %36 = vector.load %arg3[%c2, %c0_17] : memref<32x128xf32, #tpu.memory_space<vmem>>, vector<1x8xf32>
    %37 = vector.broadcast %36 : vector<1x8xf32> to vector<8x8xf32>
    %38 = arith.addf %35, %37 : vector<8x8xf32>
    %39 = arith.addf %9, %38 : vector<8x8xf32>
    %c3 = arith.constant 3 : index
    %c0_18 = arith.constant 0 : index
    %40 = vector.load %arg3[%c3, %c0_18] : memref<32x128xf32, #tpu.memory_space<vmem>>, vector<1x8xf32>
    %c4 = arith.constant 4 : index
    %c0_19 = arith.constant 0 : index
    %41 = vector.load %arg3[%c4, %c0_19] : memref<32x128xf32, #tpu.memory_space<vmem>>, vector<1x8xf32>
    %cst_20 = arith.constant dense<0.000000e+00> : vector<8xf32>
    %42 = vector.multi_reduction <add>, %39, %cst_20 [1] : vector<8x8xf32> to vector<8xf32>
    %43 = vector.shape_cast %42 : vector<8xf32> to vector<8x1xf32>
    %cst_21 = arith.constant 8.000000e+00 : f32
    %44 = vector.broadcast %cst_21 : f32 to vector<8x1xf32>
    %45 = arith.divf %43, %44 : vector<8x1xf32>
    %46 = vector.broadcast %45 : vector<8x1xf32> to vector<8x8xf32>
    %47 = arith.subf %39, %46 : vector<8x8xf32>
    %48 = arith.mulf %47, %47 : vector<8x8xf32>
    %cst_22 = arith.constant dense<0.000000e+00> : vector<8xf32>
    %49 = vector.multi_reduction <add>, %48, %cst_22 [1] : vector<8x8xf32> to vector<8xf32>
    %50 = vector.shape_cast %49 : vector<8xf32> to vector<8x1xf32>
    %cst_23 = arith.constant 8.000000e+00 : f32
    %51 = vector.broadcast %cst_23 : f32 to vector<8x1xf32>
    %52 = arith.divf %50, %51 : vector<8x1xf32>
    %53 = vector.broadcast %45 : vector<8x1xf32> to vector<8x8xf32>
    %54 = arith.subf %39, %53 : vector<8x8xf32>
    %cst_24 = arith.constant 9.99999974E-6 : f32
    %55 = vector.broadcast %cst_24 : f32 to vector<8x1xf32>
    %56 = arith.addf %52, %55 : vector<8x1xf32>
    %57 = math.rsqrt %56 : vector<8x1xf32>
    %58 = vector.broadcast %57 : vector<8x1xf32> to vector<8x8xf32>
    %59 = arith.mulf %54, %58 : vector<8x8xf32>
    %60 = vector.broadcast %40 : vector<1x8xf32> to vector<8x8xf32>
    %61 = arith.mulf %59, %60 : vector<8x8xf32>
    %62 = vector.broadcast %41 : vector<1x8xf32> to vector<8x8xf32>
    %63 = arith.addf %61, %62 : vector<8x8xf32>
    %c48 = arith.constant 48 : index
    %c0_25 = arith.constant 0 : index
    %64 = vector.load %arg4[%c48, %c0_25] : memref<496x128xbf16, #tpu.memory_space<vmem>>, vector<8x32xbf16>
    %65 = arith.truncf %63 : vector<8x8xf32> to vector<8x8xbf16>
    %cst_26 = arith.constant dense<0.000000e+00> : vector<8x32xf32>
    %66 = tpu.matmul %65, %64, %cst_26 {dimension_numbers = #tpu.dot_dimension_numbers<[1], [0], [0], [1], [0, 0, 1, 1], [], []>} : vector<8x8xbf16>, vector<8x32xbf16>, vector<8x32xf32> -> vector<8x32xf32>
    %c5 = arith.constant 5 : index
    %c0_27 = arith.constant 0 : index
    %67 = vector.load %arg3[%c5, %c0_27] : memref<32x128xf32, #tpu.memory_space<vmem>>, vector<1x32xf32>
    %68 = vector.broadcast %67 : vector<1x32xf32> to vector<8x32xf32>
    %69 = arith.addf %66, %68 : vector<8x32xf32>
    %cst_28 = arith.constant 5.000000e-01 : f32
    %70 = vector.broadcast %cst_28 : f32 to vector<8x32xf32>
    %71 = arith.mulf %70, %69 : vector<8x32xf32>
    %cst_29 = arith.constant 4.471500e-02 : f32
    %72 = vector.broadcast %cst_29 : f32 to vector<8x32xf32>
    %73 = arith.mulf %72, %69 : vector<8x32xf32>
    %74 = arith.mulf %73, %69 : vector<8x32xf32>
    %75 = arith.mulf %74, %69 : vector<8x32xf32>
    %76 = arith.addf %69, %75 : vector<8x32xf32>
    %cst_30 = arith.constant 0.797884583 : f32
    %77 = vector.broadcast %cst_30 : f32 to vector<8x32xf32>
    %78 = arith.mulf %77, %76 : vector<8x32xf32>
    %79 = math.tanh %78 : vector<8x32xf32>
    %cst_31 = arith.constant 1.000000e+00 : f32
    %80 = vector.broadcast %cst_31 : f32 to vector<8x32xf32>
    %81 = arith.addf %80, %79 : vector<8x32xf32>
    %82 = arith.mulf %71, %81 : vector<8x32xf32>
    %c64 = arith.constant 64 : index
    %c0_32 = arith.constant 0 : index
    %83 = vector.load %arg4[%c64, %c0_32] : memref<496x128xbf16, #tpu.memory_space<vmem>>, vector<32x8xbf16>
    %84 = arith.truncf %82 : vector<8x32xf32> to vector<8x32xbf16>
    %cst_33 = arith.constant dense<0.000000e+00> : vector<8x8xf32>
    %85 = tpu.matmul %84, %83, %cst_33 {dimension_numbers = #tpu.dot_dimension_numbers<[1], [0], [0], [1], [0, 0, 1, 1], [], []>} : vector<8x32xbf16>, vector<32x8xbf16>, vector<8x8xf32> -> vector<8x8xf32>
    %c6 = arith.constant 6 : index
    %c0_34 = arith.constant 0 : index
    %86 = vector.load %arg3[%c6, %c0_34] : memref<32x128xf32, #tpu.memory_space<vmem>>, vector<1x8xf32>
    %87 = vector.broadcast %86 : vector<1x8xf32> to vector<8x8xf32>
    %88 = arith.addf %85, %87 : vector<8x8xf32>
    %89 = arith.addf %63, %88 : vector<8x8xf32>
    %c7 = arith.constant 7 : index
    %c0_35 = arith.constant 0 : index
    %90 = vector.load %arg3[%c7, %c0_35] : memref<32x128xf32, #tpu.memory_space<vmem>>, vector<1x8xf32>
    %c8 = arith.constant 8 : index
    %c0_36 = arith.constant 0 : index
    %91 = vector.load %arg3[%c8, %c0_36] : memref<32x128xf32, #tpu.memory_space<vmem>>, vector<1x8xf32>
    %cst_37 = arith.constant dense<0.000000e+00> : vector<8xf32>
    %92 = vector.multi_reduction <add>, %89, %cst_37 [1] : vector<8x8xf32> to vector<8xf32>
    %93 = vector.shape_cast %92 : vector<8xf32> to vector<8x1xf32>
    %cst_38 = arith.constant 8.000000e+00 : f32
    %94 = vector.broadcast %cst_38 : f32 to vector<8x1xf32>
    %95 = arith.divf %93, %94 : vector<8x1xf32>
    %96 = vector.broadcast %95 : vector<8x1xf32> to vector<8x8xf32>
    %97 = arith.subf %89, %96 : vector<8x8xf32>
    %98 = arith.mulf %97, %97 : vector<8x8xf32>
    %cst_39 = arith.constant dense<0.000000e+00> : vector<8xf32>
    %99 = vector.multi_reduction <add>, %98, %cst_39 [1] : vector<8x8xf32> to vector<8xf32>
    %100 = vector.shape_cast %99 : vector<8xf32> to vector<8x1xf32>
    %cst_40 = arith.constant 8.000000e+00 : f32
    %101 = vector.broadcast %cst_40 : f32 to vector<8x1xf32>
    %102 = arith.divf %100, %101 : vector<8x1xf32>
    %103 = vector.broadcast %95 : vector<8x1xf32> to vector<8x8xf32>
    %104 = arith.subf %89, %103 : vector<8x8xf32>
    %cst_41 = arith.constant 9.99999974E-6 : f32
    %105 = vector.broadcast %cst_41 : f32 to vector<8x1xf32>
    %106 = arith.addf %102, %105 : vector<8x1xf32>
    %107 = math.rsqrt %106 : vector<8x1xf32>
    %108 = vector.broadcast %107 : vector<8x1xf32> to vector<8x8xf32>
    %109 = arith.mulf %104, %108 : vector<8x8xf32>
    %110 = vector.broadcast %90 : vector<1x8xf32> to vector<8x8xf32>
    %111 = arith.mulf %109, %110 : vector<8x8xf32>
    %112 = vector.broadcast %91 : vector<1x8xf32> to vector<8x8xf32>
    %113 = arith.addf %111, %112 : vector<8x8xf32>
    %c0_42 = arith.constant 0 : index
    %c0_43 = arith.constant 0 : index
    %114 = vector.load %arg6[%c0_42, %c0_43] : memref<8x16xf32, #tpu.memory_space<vmem>>, vector<8x8xf32>
    tpu.vector_store %arg6[%c0_42, %c0_43], %113 {strides = array<i32>} : memref<8x16xf32, #tpu.memory_space<vmem>>, vector<8x8xf32>,
    %c0_44 = arith.constant 0 : index
    %c0_45 = arith.constant 0 : index
    %115 = tpu.strided_load %arg6[%c0_44, %c0_45] {strides = array<i32: 2, 1>} : memref<8x16xf32, #tpu.memory_space<vmem>>, vector<4x8xf32>
    %c1_46 = arith.constant 1 : index
    %c0_47 = arith.constant 0 : index
    %116 = tpu.strided_load %arg6[%c1_46, %c0_47] {strides = array<i32: 2, 1>} : memref<8x16xf32, #tpu.memory_space<vmem>>, vector<4x8xf32>
    %c96 = arith.constant 96 : index
    %c0_48 = arith.constant 0 : index
    %117 = vector.load %arg4[%c96, %c0_48] : memref<496x128xbf16, #tpu.memory_space<vmem>>, vector<8x16xbf16>
    %118 = arith.truncf %115 : vector<4x8xf32> to vector<4x8xbf16>
    %cst_49 = arith.constant dense<0.000000e+00> : vector<4x16xf32>
    %119 = tpu.matmul %118, %117, %cst_49 {dimension_numbers = #tpu.dot_dimension_numbers<[1], [0], [0], [1], [0, 0, 1, 1], [], []>} : vector<4x8xbf16>, vector<8x16xbf16>, vector<4x16xf32> -> vector<4x16xf32>
    %c112 = arith.constant 112 : index
    %c0_50 = arith.constant 0 : index
    %120 = vector.load %arg4[%c112, %c0_50] : memref<496x128xbf16, #tpu.memory_space<vmem>>, vector<8x16xbf16>
    %121 = arith.truncf %116 : vector<4x8xf32> to vector<4x8xbf16>
    %cst_51 = arith.constant dense<0.000000e+00> : vector<4x16xf32>
    %122 = tpu.matmul %121, %120, %cst_51 {dimension_numbers = #tpu.dot_dimension_numbers<[1], [0], [0], [1], [0, 0, 1, 1], [], []>} : vector<4x8xbf16>, vector<8x16xbf16>, vector<4x16xf32> -> vector<4x16xf32>
    %123 = arith.addf %119, %122 : vector<4x16xf32>
    %c9 = arith.constant 9 : index
    %c0_52 = arith.constant 0 : index
    %124 = vector.load %arg3[%c9, %c0_52] : memref<32x128xf32, #tpu.memory_space<vmem>>, vector<1x16xf32>
    %125 = vector.broadcast %124 : vector<1x16xf32> to vector<4x16xf32>
    %126 = arith.addf %123, %125 : vector<4x16xf32>
    %c128 = arith.constant 128 : index
    %c0_53 = arith.constant 0 : index
    %127 = vector.load %arg4[%c128, %c0_53] : memref<496x128xbf16, #tpu.memory_space<vmem>>, vector<16x32xbf16>
    %128 = arith.truncf %126 : vector<4x16xf32> to vector<4x16xbf16>
    %cst_54 = arith.constant dense<0.000000e+00> : vector<4x32xf32>
    %129 = tpu.matmul %128, %127, %cst_54 {dimension_numbers = #tpu.dot_dimension_numbers<[1], [0], [0], [1], [0, 0, 1, 1], [], []>} : vector<4x16xbf16>, vector<16x32xbf16>, vector<4x32xf32> -> vector<4x32xf32>
    %c10 = arith.constant 10 : index
    %c0_55 = arith.constant 0 : index
    %130 = vector.load %arg3[%c10, %c0_55] : memref<32x128xf32, #tpu.memory_space<vmem>>, vector<1x32xf32>
    %131 = vector.broadcast %130 : vector<1x32xf32> to vector<4x32xf32>
    %132 = arith.addf %129, %131 : vector<4x32xf32>
    %133 = vector.extract_strided_slice %132 {offsets = [0, 0], sizes = [4, 16], strides = [1, 1]} : vector<4x32xf32> to vector<4x16xf32>
    %134 = arith.truncf %133 : vector<4x16xf32> to vector<4x16xbf16>
    %135 = vector.extract_strided_slice %132 {offsets = [0, 16], sizes = [4, 16], strides = [1, 1]} : vector<4x32xf32> to vector<4x16xf32>
    %136 = arith.truncf %135 : vector<4x16xf32> to vector<4x16xbf16>
    %cst_56 = arith.constant dense<0.000000e+00> : vector<4x4xf32>
    %137 = tpu.matmul %134, %136, %cst_56 {dimension_numbers = #tpu.dot_dimension_numbers<[1], [1], [0], [0], [0, 0, 1, 0], [], []>} : vector<4x16xbf16>, vector<4x16xbf16>, vector<4x4xf32> -> vector<4x4xf32>
    %cst_57 = arith.constant dense<0xFF800000> : vector<4xf32>
    %138 = vector.multi_reduction <maximumf>, %137, %cst_57 [1] : vector<4x4xf32> to vector<4xf32>
    %139 = vector.shape_cast %138 : vector<4xf32> to vector<4x1xf32>
    %140 = vector.broadcast %139 : vector<4x1xf32> to vector<4x4xf32>
    %141 = arith.subf %137, %140 : vector<4x4xf32>
    %142 = math.exp %141 : vector<4x4xf32>
    %cst_58 = arith.constant dense<0.000000e+00> : vector<4xf32>
    %143 = vector.multi_reduction <add>, %142, %cst_58 [1] : vector<4x4xf32> to vector<4xf32>
    %144 = vector.shape_cast %143 : vector<4xf32> to vector<4x1xf32>
    %145 = tpu.reciprocal %144 {approx = true} : vector<4x1xf32> -> vector<4x1xf32>
    %146 = vector.broadcast %145 : vector<4x1xf32> to vector<4x4xf32>
    %147 = arith.mulf %142, %146 : vector<4x4xf32>
    %148 = arith.truncf %147 : vector<4x4xf32> to vector<4x4xbf16>
    %cst_59 = arith.constant dense<0.000000e+00> : vector<4x16xf32>
    %149 = tpu.matmul %148, %136, %cst_59 {dimension_numbers = #tpu.dot_dimension_numbers<[1], [0], [0], [1], [0, 0, 1, 1], [], []>} : vector<4x4xbf16>, vector<4x16xbf16>, vector<4x16xf32> -> vector<4x16xf32>
    %c144 = arith.constant 144 : index
    %c0_60 = arith.constant 0 : index
    %150 = vector.load %arg4[%c144, %c0_60] : memref<496x128xbf16, #tpu.memory_space<vmem>>, vector<16x16xbf16>
    %151 = arith.truncf %149 : vector<4x16xf32> to vector<4x16xbf16>
    %cst_61 = arith.constant dense<0.000000e+00> : vector<4x16xf32>
    %152 = tpu.matmul %151, %150, %cst_61 {dimension_numbers = #tpu.dot_dimension_numbers<[1], [0], [0], [1], [0, 0, 1, 1], [], []>} : vector<4x16xbf16>, vector<16x16xbf16>, vector<4x16xf32> -> vector<4x16xf32>
    %c11 = arith.constant 11 : index
    %c0_62 = arith.constant 0 : index
    %153 = vector.load %arg3[%c11, %c0_62] : memref<32x128xf32, #tpu.memory_space<vmem>>, vector<1x16xf32>
    %154 = vector.broadcast %153 : vector<1x16xf32> to vector<4x16xf32>
    %155 = arith.addf %152, %154 : vector<4x16xf32>
    %156 = arith.addf %126, %155 : vector<4x16xf32>
    %c12 = arith.constant 12 : index
    %c0_63 = arith.constant 0 : index
    %157 = vector.load %arg3[%c12, %c0_63] : memref<32x128xf32, #tpu.memory_space<vmem>>, vector<1x16xf32>
    %c13 = arith.constant 13 : index
    %c0_64 = arith.constant 0 : index
    %158 = vector.load %arg3[%c13, %c0_64] : memref<32x128xf32, #tpu.memory_space<vmem>>, vector<1x16xf32>
    %cst_65 = arith.constant dense<0.000000e+00> : vector<4xf32>
    %159 = vector.multi_reduction <add>, %156, %cst_65 [1] : vector<4x16xf32> to vector<4xf32>
    %160 = vector.shape_cast %159 : vector<4xf32> to vector<4x1xf32>
    %cst_66 = arith.constant 1.600000e+01 : f32
    %161 = vector.broadcast %cst_66 : f32 to vector<4x1xf32>
    %162 = arith.divf %160, %161 : vector<4x1xf32>
    %163 = vector.broadcast %162 : vector<4x1xf32> to vector<4x16xf32>
    %164 = arith.subf %156, %163 : vector<4x16xf32>
    %165 = arith.mulf %164, %164 : vector<4x16xf32>
    %cst_67 = arith.constant dense<0.000000e+00> : vector<4xf32>
    %166 = vector.multi_reduction <add>, %165, %cst_67 [1] : vector<4x16xf32> to vector<4xf32>
    %167 = vector.shape_cast %166 : vector<4xf32> to vector<4x1xf32>
    %cst_68 = arith.constant 1.600000e+01 : f32
    %168 = vector.broadcast %cst_68 : f32 to vector<4x1xf32>
    %169 = arith.divf %167, %168 : vector<4x1xf32>
    %170 = vector.broadcast %162 : vector<4x1xf32> to vector<4x16xf32>
    %171 = arith.subf %156, %170 : vector<4x16xf32>
    %cst_69 = arith.constant 9.99999974E-6 : f32
    %172 = vector.broadcast %cst_69 : f32 to vector<4x1xf32>
    %173 = arith.addf %169, %172 : vector<4x1xf32>
    %174 = math.rsqrt %173 : vector<4x1xf32>
    %175 = vector.broadcast %174 : vector<4x1xf32> to vector<4x16xf32>
    %176 = arith.mulf %171, %175 : vector<4x16xf32>
    %177 = vector.broadcast %157 : vector<1x16xf32> to vector<4x16xf32>
    %178 = arith.mulf %176, %177 : vector<4x16xf32>
    %179 = vector.broadcast %158 : vector<1x16xf32> to vector<4x16xf32>
    %180 = arith.addf %178, %179 : vector<4x16xf32>
    %c160 = arith.constant 160 : index
    %c0_70 = arith.constant 0 : index
    %181 = vector.load %arg4[%c160, %c0_70] : memref<496x128xbf16, #tpu.memory_space<vmem>>, vector<16x64xbf16>
    %182 = arith.truncf %180 : vector<4x16xf32> to vector<4x16xbf16>
    %cst_71 = arith.constant dense<0.000000e+00> : vector<4x64xf32>
    %183 = tpu.matmul %182, %181, %cst_71 {dimension_numbers = #tpu.dot_dimension_numbers<[1], [0], [0], [1], [0, 0, 1, 1], [], []>} : vector<4x16xbf16>, vector<16x64xbf16>, vector<4x64xf32> -> vector<4x64xf32>
    %c14 = arith.constant 14 : index
    %c0_72 = arith.constant 0 : index
    %184 = vector.load %arg3[%c14, %c0_72] : memref<32x128xf32, #tpu.memory_space<vmem>>, vector<1x64xf32>
    %185 = vector.broadcast %184 : vector<1x64xf32> to vector<4x64xf32>
    %186 = arith.addf %183, %185 : vector<4x64xf32>
    %cst_73 = arith.constant 5.000000e-01 : f32
    %187 = vector.broadcast %cst_73 : f32 to vector<4x64xf32>
    %188 = arith.mulf %187, %186 : vector<4x64xf32>
    %cst_74 = arith.constant 4.471500e-02 : f32
    %189 = vector.broadcast %cst_74 : f32 to vector<4x64xf32>
    %190 = arith.mulf %189, %186 : vector<4x64xf32>
    %191 = arith.mulf %190, %186 : vector<4x64xf32>
    %192 = arith.mulf %191, %186 : vector<4x64xf32>
    %193 = arith.addf %186, %192 : vector<4x64xf32>
    %cst_75 = arith.constant 0.797884583 : f32
    %194 = vector.broadcast %cst_75 : f32 to vector<4x64xf32>
    %195 = arith.mulf %194, %193 : vector<4x64xf32>
    %196 = math.tanh %195 : vector<4x64xf32>
    %cst_76 = arith.constant 1.000000e+00 : f32
    %197 = vector.broadcast %cst_76 : f32 to vector<4x64xf32>
    %198 = arith.addf %197, %196 : vector<4x64xf32>
    %199 = arith.mulf %188, %198 : vector<4x64xf32>
    %c176 = arith.constant 176 : index
    %c0_77 = arith.constant 0 : index
    %200 = vector.load %arg4[%c176, %c0_77] : memref<496x128xbf16, #tpu.memory_space<vmem>>, vector<64x16xbf16>
    %201 = arith.truncf %199 : vector<4x64xf32> to vector<4x64xbf16>
    %cst_78 = arith.constant dense<0.000000e+00> : vector<4x16xf32>
    %202 = tpu.matmul %201, %200, %cst_78 {dimension_numbers = #tpu.dot_dimension_numbers<[1], [0], [0], [1], [0, 0, 1, 1], [], []>} : vector<4x64xbf16>, vector<64x16xbf16>, vector<4x16xf32> -> vector<4x16xf32>
    %c15 = arith.constant 15 : index
    %c0_79 = arith.constant 0 : index
    %203 = vector.load %arg3[%c15, %c0_79] : memref<32x128xf32, #tpu.memory_space<vmem>>, vector<1x16xf32>
    %204 = vector.broadcast %203 : vector<1x16xf32> to vector<4x16xf32>
    %205 = arith.addf %202, %204 : vector<4x16xf32>
    %206 = arith.addf %180, %205 : vector<4x16xf32>
    %c16_80 = arith.constant 16 : index
    %c0_81 = arith.constant 0 : index
    %207 = vector.load %arg3[%c16_80, %c0_81] : memref<32x128xf32, #tpu.memory_space<vmem>>, vector<1x16xf32>
    %c17 = arith.constant 17 : index
    %c0_82 = arith.constant 0 : index
    %208 = vector.load %arg3[%c17, %c0_82] : memref<32x128xf32, #tpu.memory_space<vmem>>, vector<1x16xf32>
    %cst_83 = arith.constant dense<0.000000e+00> : vector<4xf32>
    %209 = vector.multi_reduction <add>, %206, %cst_83 [1] : vector<4x16xf32> to vector<4xf32>
    %210 = vector.shape_cast %209 : vector<4xf32> to vector<4x1xf32>
    %cst_84 = arith.constant 1.600000e+01 : f32
    %211 = vector.broadcast %cst_84 : f32 to vector<4x1xf32>
    %212 = arith.divf %210, %211 : vector<4x1xf32>
    %213 = vector.broadcast %212 : vector<4x1xf32> to vector<4x16xf32>
    %214 = arith.subf %206, %213 : vector<4x16xf32>
    %215 = arith.mulf %214, %214 : vector<4x16xf32>
    %cst_85 = arith.constant dense<0.000000e+00> : vector<4xf32>
    %216 = vector.multi_reduction <add>, %215, %cst_85 [1] : vector<4x16xf32> to vector<4xf32>
    %217 = vector.shape_cast %216 : vector<4xf32> to vector<4x1xf32>
    %cst_86 = arith.constant 1.600000e+01 : f32
    %218 = vector.broadcast %cst_86 : f32 to vector<4x1xf32>
    %219 = arith.divf %217, %218 : vector<4x1xf32>
    %220 = vector.broadcast %212 : vector<4x1xf32> to vector<4x16xf32>
    %221 = arith.subf %206, %220 : vector<4x16xf32>
    %cst_87 = arith.constant 9.99999974E-6 : f32
    %222 = vector.broadcast %cst_87 : f32 to vector<4x1xf32>
    %223 = arith.addf %219, %222 : vector<4x1xf32>
    %224 = math.rsqrt %223 : vector<4x1xf32>
    %225 = vector.broadcast %224 : vector<4x1xf32> to vector<4x16xf32>
    %226 = arith.mulf %221, %225 : vector<4x16xf32>
    %227 = vector.broadcast %207 : vector<1x16xf32> to vector<4x16xf32>
    %228 = arith.mulf %226, %227 : vector<4x16xf32>
    %229 = vector.broadcast %208 : vector<1x16xf32> to vector<4x16xf32>
    %230 = arith.addf %228, %229 : vector<4x16xf32>
    %c0_88 = arith.constant 0 : index
    %c0_89 = arith.constant 0 : index
    %231 = vector.load %arg6[%c0_88, %c0_89] : memref<8x16xf32, #tpu.memory_space<vmem>>, vector<4x16xf32>
    tpu.vector_store %arg6[%c0_88, %c0_89], %230 {strides = array<i32>} : memref<8x16xf32, #tpu.memory_space<vmem>>, vector<4x16xf32>,
    %c0_90 = arith.constant 0 : index
    %c0_91 = arith.constant 0 : index
    %232 = tpu.strided_load %arg6[%c0_90, %c0_91] {strides = array<i32: 2, 1>} : memref<8x16xf32, #tpu.memory_space<vmem>>, vector<2x16xf32>
    %c1_92 = arith.constant 1 : index
    %c0_93 = arith.constant 0 : index
    %233 = tpu.strided_load %arg6[%c1_92, %c0_93] {strides = array<i32: 2, 1>} : memref<8x16xf32, #tpu.memory_space<vmem>>, vector<2x16xf32>
    %c240 = arith.constant 240 : index
    %c0_94 = arith.constant 0 : index
    %234 = vector.load %arg4[%c240, %c0_94] : memref<496x128xbf16, #tpu.memory_space<vmem>>, vector<16x32xbf16>
    %235 = arith.truncf %232 : vector<2x16xf32> to vector<2x16xbf16>
    %cst_95 = arith.constant dense<0.000000e+00> : vector<2x32xf32>
    %236 = tpu.matmul %235, %234, %cst_95 {dimension_numbers = #tpu.dot_dimension_numbers<[1], [0], [0], [1], [0, 0, 1, 1], [], []>} : vector<2x16xbf16>, vector<16x32xbf16>, vector<2x32xf32> -> vector<2x32xf32>
    %c256 = arith.constant 256 : index
    %c0_96 = arith.constant 0 : index
    %237 = vector.load %arg4[%c256, %c0_96] : memref<496x128xbf16, #tpu.memory_space<vmem>>, vector<16x32xbf16>
    %238 = arith.truncf %233 : vector<2x16xf32> to vector<2x16xbf16>
    %cst_97 = arith.constant dense<0.000000e+00> : vector<2x32xf32>
    %239 = tpu.matmul %238, %237, %cst_97 {dimension_numbers = #tpu.dot_dimension_numbers<[1], [0], [0], [1], [0, 0, 1, 1], [], []>} : vector<2x16xbf16>, vector<16x32xbf16>, vector<2x32xf32> -> vector<2x32xf32>
    %240 = arith.addf %236, %239 : vector<2x32xf32>
    %c18 = arith.constant 18 : index
    %c0_98 = arith.constant 0 : index
    %241 = vector.load %arg3[%c18, %c0_98] : memref<32x128xf32, #tpu.memory_space<vmem>>, vector<1x32xf32>
    %242 = vector.broadcast %241 : vector<1x32xf32> to vector<2x32xf32>
    %243 = arith.addf %240, %242 : vector<2x32xf32>
    %c272 = arith.constant 272 : index
    %c0_99 = arith.constant 0 : index
    %244 = vector.load %arg4[%c272, %c0_99] : memref<496x128xbf16, #tpu.memory_space<vmem>>, vector<32x64xbf16>
    %245 = arith.truncf %243 : vector<2x32xf32> to vector<2x32xbf16>
    %cst_100 = arith.constant dense<0.000000e+00> : vector<2x64xf32>
    %246 = tpu.matmul %245, %244, %cst_100 {dimension_numbers = #tpu.dot_dimension_numbers<[1], [0], [0], [1], [0, 0, 1, 1], [], []>} : vector<2x32xbf16>, vector<32x64xbf16>, vector<2x64xf32> -> vector<2x64xf32>
    %c19 = arith.constant 19 : index
    %c0_101 = arith.constant 0 : index
    %247 = vector.load %arg3[%c19, %c0_101] : memref<32x128xf32, #tpu.memory_space<vmem>>, vector<1x64xf32>
    %248 = vector.broadcast %247 : vector<1x64xf32> to vector<2x64xf32>
    %249 = arith.addf %246, %248 : vector<2x64xf32>
    %250 = vector.extract_strided_slice %249 {offsets = [0, 0], sizes = [2, 32], strides = [1, 1]} : vector<2x64xf32> to vector<2x32xf32>
    %251 = arith.truncf %250 : vector<2x32xf32> to vector<2x32xbf16>
    %252 = vector.extract_strided_slice %249 {offsets = [0, 32], sizes = [2, 32], strides = [1, 1]} : vector<2x64xf32> to vector<2x32xf32>
    %253 = arith.truncf %252 : vector<2x32xf32> to vector<2x32xbf16>
    %cst_102 = arith.constant dense<0.000000e+00> : vector<2x2xf32>
    %254 = tpu.matmul %251, %253, %cst_102 {dimension_numbers = #tpu.dot_dimension_numbers<[1], [1], [0], [0], [0, 0, 1, 0], [], []>} : vector<2x32xbf16>, vector<2x32xbf16>, vector<2x2xf32> -> vector<2x2xf32>
    %cst_103 = arith.constant dense<0xFF800000> : vector<2xf32>
    %255 = vector.multi_reduction <maximumf>, %254, %cst_103 [1] : vector<2x2xf32> to vector<2xf32>
    %256 = vector.shape_cast %255 : vector<2xf32> to vector<2x1xf32>
    %257 = vector.broadcast %256 : vector<2x1xf32> to vector<2x2xf32>
    %258 = arith.subf %254, %257 : vector<2x2xf32>
    %259 = math.exp %258 : vector<2x2xf32>
    %cst_104 = arith.constant dense<0.000000e+00> : vector<2xf32>
    %260 = vector.multi_reduction <add>, %259, %cst_104 [1] : vector<2x2xf32> to vector<2xf32>
    %261 = vector.shape_cast %260 : vector<2xf32> to vector<2x1xf32>
    %262 = tpu.reciprocal %261 {approx = true} : vector<2x1xf32> -> vector<2x1xf32>
    %263 = vector.broadcast %262 : vector<2x1xf32> to vector<2x2xf32>
    %264 = arith.mulf %259, %263 : vector<2x2xf32>
    %265 = arith.truncf %264 : vector<2x2xf32> to vector<2x2xbf16>
    %cst_105 = arith.constant dense<0.000000e+00> : vector<2x32xf32>
    %266 = tpu.matmul %265, %253, %cst_105 {dimension_numbers = #tpu.dot_dimension_numbers<[1], [0], [0], [1], [0, 0, 1, 1], [], []>} : vector<2x2xbf16>, vector<2x32xbf16>, vector<2x32xf32> -> vector<2x32xf32>
    %c304 = arith.constant 304 : index
    %c0_106 = arith.constant 0 : index
    %267 = vector.load %arg4[%c304, %c0_106] : memref<496x128xbf16, #tpu.memory_space<vmem>>, vector<32x32xbf16>
    %268 = arith.truncf %266 : vector<2x32xf32> to vector<2x32xbf16>
    %cst_107 = arith.constant dense<0.000000e+00> : vector<2x32xf32>
    %269 = tpu.matmul %268, %267, %cst_107 {dimension_numbers = #tpu.dot_dimension_numbers<[1], [0], [0], [1], [0, 0, 1, 1], [], []>} : vector<2x32xbf16>, vector<32x32xbf16>, vector<2x32xf32> -> vector<2x32xf32>
    %c20 = arith.constant 20 : index
    %c0_108 = arith.constant 0 : index
    %270 = vector.load %arg3[%c20, %c0_108] : memref<32x128xf32, #tpu.memory_space<vmem>>, vector<1x32xf32>
    %271 = vector.broadcast %270 : vector<1x32xf32> to vector<2x32xf32>
    %272 = arith.addf %269, %271 : vector<2x32xf32>
    %273 = arith.addf %243, %272 : vector<2x32xf32>
    %c21 = arith.constant 21 : index
    %c0_109 = arith.constant 0 : index
    %274 = vector.load %arg3[%c21, %c0_109] : memref<32x128xf32, #tpu.memory_space<vmem>>, vector<1x32xf32>
    %c22 = arith.constant 22 : index
    %c0_110 = arith.constant 0 : index
    %275 = vector.load %arg3[%c22, %c0_110] : memref<32x128xf32, #tpu.memory_space<vmem>>, vector<1x32xf32>
    %cst_111 = arith.constant dense<0.000000e+00> : vector<2xf32>
    %276 = vector.multi_reduction <add>, %273, %cst_111 [1] : vector<2x32xf32> to vector<2xf32>
    %277 = vector.shape_cast %276 : vector<2xf32> to vector<2x1xf32>
    %cst_112 = arith.constant 3.200000e+01 : f32
    %278 = vector.broadcast %cst_112 : f32 to vector<2x1xf32>
    %279 = arith.divf %277, %278 : vector<2x1xf32>
    %280 = vector.broadcast %279 : vector<2x1xf32> to vector<2x32xf32>
    %281 = arith.subf %273, %280 : vector<2x32xf32>
    %282 = arith.mulf %281, %281 : vector<2x32xf32>
    %cst_113 = arith.constant dense<0.000000e+00> : vector<2xf32>
    %283 = vector.multi_reduction <add>, %282, %cst_113 [1] : vector<2x32xf32> to vector<2xf32>
    %284 = vector.shape_cast %283 : vector<2xf32> to vector<2x1xf32>
    %cst_114 = arith.constant 3.200000e+01 : f32
    %285 = vector.broadcast %cst_114 : f32 to vector<2x1xf32>
    %286 = arith.divf %284, %285 : vector<2x1xf32>
    %287 = vector.broadcast %279 : vector<2x1xf32> to vector<2x32xf32>
    %288 = arith.subf %273, %287 : vector<2x32xf32>
    %cst_115 = arith.constant 9.99999974E-6 : f32
    %289 = vector.broadcast %cst_115 : f32 to vector<2x1xf32>
    %290 = arith.addf %286, %289 : vector<2x1xf32>
    %291 = math.rsqrt %290 : vector<2x1xf32>
    %292 = vector.broadcast %291 : vector<2x1xf32> to vector<2x32xf32>
    %293 = arith.mulf %288, %292 : vector<2x32xf32>
    %294 = vector.broadcast %274 : vector<1x32xf32> to vector<2x32xf32>
    %295 = arith.mulf %293, %294 : vector<2x32xf32>
    %296 = vector.broadcast %275 : vector<1x32xf32> to vector<2x32xf32>
    %297 = arith.addf %295, %296 : vector<2x32xf32>
    %c336 = arith.constant 336 : index
    %c0_116 = arith.constant 0 : index
    %298 = vector.load %arg4[%c336, %c0_116] : memref<496x128xbf16, #tpu.memory_space<vmem>>, vector<32x128xbf16>
    %299 = arith.truncf %297 : vector<2x32xf32> to vector<2x32xbf16>
    %cst_117 = arith.constant dense<0.000000e+00> : vector<2x128xf32>
    %300 = tpu.matmul %299, %298, %cst_117 {dimension_numbers = #tpu.dot_dimension_numbers<[1], [0], [0], [1], [0, 0, 1, 1], [], []>} : vector<2x32xbf16>, vector<32x128xbf16>, vector<2x128xf32> -> vector<2x128xf32>
    %c23 = arith.constant 23 : index
    %c0_118 = arith.constant 0 : index
    %301 = vector.load %arg3[%c23, %c0_118] : memref<32x128xf32, #tpu.memory_space<vmem>>, vector<1x128xf32>
    %302 = vector.broadcast %301 : vector<1x128xf32> to vector<2x128xf32>
    %303 = arith.addf %300, %302 : vector<2x128xf32>
    %cst_119 = arith.constant 5.000000e-01 : f32
    %304 = vector.broadcast %cst_119 : f32 to vector<2x128xf32>
    %305 = arith.mulf %304, %303 : vector<2x128xf32>
    %cst_120 = arith.constant 4.471500e-02 : f32
    %306 = vector.broadcast %cst_120 : f32 to vector<2x128xf32>
    %307 = arith.mulf %306, %303 : vector<2x128xf32>
    %308 = arith.mulf %307, %303 : vector<2x128xf32>
    %309 = arith.mulf %308, %303 : vector<2x128xf32>
    %310 = arith.addf %303, %309 : vector<2x128xf32>
    %cst_121 = arith.constant 0.797884583 : f32
    %311 = vector.broadcast %cst_121 : f32 to vector<2x128xf32>
    %312 = arith.mulf %311, %310 : vector<2x128xf32>
    %313 = math.tanh %312 : vector<2x128xf32>
    %cst_122 = arith.constant 1.000000e+00 : f32
    %314 = vector.broadcast %cst_122 : f32 to vector<2x128xf32>
    %315 = arith.addf %314, %313 : vector<2x128xf32>
    %316 = arith.mulf %305, %315 : vector<2x128xf32>
    %c368 = arith.constant 368 : index
    %c0_123 = arith.constant 0 : index
    %317 = vector.load %arg4[%c368, %c0_123] : memref<496x128xbf16, #tpu.memory_space<vmem>>, vector<128x32xbf16>
    %318 = arith.truncf %316 : vector<2x128xf32> to vector<2x128xbf16>
    %cst_124 = arith.constant dense<0.000000e+00> : vector<2x32xf32>
    %319 = tpu.matmul %318, %317, %cst_124 {dimension_numbers = #tpu.dot_dimension_numbers<[1], [0], [0], [1], [0, 0, 1, 1], [], []>} : vector<2x128xbf16>, vector<128x32xbf16>, vector<2x32xf32> -> vector<2x32xf32>
    %c24 = arith.constant 24 : index
    %c0_125 = arith.constant 0 : index
    %320 = vector.load %arg3[%c24, %c0_125] : memref<32x128xf32, #tpu.memory_space<vmem>>, vector<1x32xf32>
    %321 = vector.broadcast %320 : vector<1x32xf32> to vector<2x32xf32>
    %322 = arith.addf %319, %321 : vector<2x32xf32>
    %323 = arith.addf %297, %322 : vector<2x32xf32>
    %c25 = arith.constant 25 : index
    %c0_126 = arith.constant 0 : index
    %324 = vector.load %arg3[%c25, %c0_126] : memref<32x128xf32, #tpu.memory_space<vmem>>, vector<1x32xf32>
    %c26 = arith.constant 26 : index
    %c0_127 = arith.constant 0 : index
    %325 = vector.load %arg3[%c26, %c0_127] : memref<32x128xf32, #tpu.memory_space<vmem>>, vector<1x32xf32>
    %cst_128 = arith.constant dense<0.000000e+00> : vector<2xf32>
    %326 = vector.multi_reduction <add>, %323, %cst_128 [1] : vector<2x32xf32> to vector<2xf32>
    %327 = vector.shape_cast %326 : vector<2xf32> to vector<2x1xf32>
    %cst_129 = arith.constant 3.200000e+01 : f32
    %328 = vector.broadcast %cst_129 : f32 to vector<2x1xf32>
    %329 = arith.divf %327, %328 : vector<2x1xf32>
    %330 = vector.broadcast %329 : vector<2x1xf32> to vector<2x32xf32>
    %331 = arith.subf %323, %330 : vector<2x32xf32>
    %332 = arith.mulf %331, %331 : vector<2x32xf32>
    %cst_130 = arith.constant dense<0.000000e+00> : vector<2xf32>
    %333 = vector.multi_reduction <add>, %332, %cst_130 [1] : vector<2x32xf32> to vector<2xf32>
    %334 = vector.shape_cast %333 : vector<2xf32> to vector<2x1xf32>
    %cst_131 = arith.constant 3.200000e+01 : f32
    %335 = vector.broadcast %cst_131 : f32 to vector<2x1xf32>
    %336 = arith.divf %334, %335 : vector<2x1xf32>
    %337 = vector.broadcast %329 : vector<2x1xf32> to vector<2x32xf32>
    %338 = arith.subf %323, %337 : vector<2x32xf32>
    %cst_132 = arith.constant 9.99999974E-6 : f32
    %339 = vector.broadcast %cst_132 : f32 to vector<2x1xf32>
    %340 = arith.addf %336, %339 : vector<2x1xf32>
    %341 = math.rsqrt %340 : vector<2x1xf32>
    %342 = vector.broadcast %341 : vector<2x1xf32> to vector<2x32xf32>
    %343 = arith.mulf %338, %342 : vector<2x32xf32>
    %344 = vector.broadcast %324 : vector<1x32xf32> to vector<2x32xf32>
    %345 = arith.mulf %343, %344 : vector<2x32xf32>
    %346 = vector.broadcast %325 : vector<1x32xf32> to vector<2x32xf32>
    %347 = arith.addf %345, %346 : vector<2x32xf32>
    %c0_133 = arith.constant 0 : index
    %c0_134 = arith.constant 0 : index
    %c0_135 = arith.constant 0 : index
    %348 = vector.load %arg5[%c0_133, %c0_134, %c0_135] : memref<1x2x32xf32, #tpu.memory_space<vmem>>, vector<1x2x32xf32>
    %349 = vector.shape_cast %348 : vector<1x2x32xf32> to vector<2x32xf32>
    %350 = vector.shape_cast %347 : vector<2x32xf32> to vector<1x2x32xf32>
    tpu.vector_store %arg5[%c0_133, %c0_134, %c0_135], %350 {strides = array<i32>} : memref<1x2x32xf32, #tpu.memory_space<vmem>>, vector<1x2x32xf32>,
    return
  }
  func.func @transform_0(%arg0: i32) -> (i32, i32, i32) {
    %c0_i32 = arith.constant 0 : i32
    %c0_i32_0 = arith.constant 0 : i32
    %c0_i32_1 = arith.constant 0 : i32
    return %arg0, %c0_i32, %c0_i32_0 : i32, i32, i32
  }
  func.func @transform_1(%arg0: i32) -> (i32, i32) {
    %c0_i32 = arith.constant 0 : i32
    %c0_i32_0 = arith.constant 0 : i32
    %c0_i32_1 = arith.constant 0 : i32
    return %c0_i32, %c0_i32_0 : i32, i32
  }
  func.func @transform_2(%arg0: i32) -> (i32, i32) {
    %c0_i32 = arith.constant 0 : i32
    %c0_i32_0 = arith.constant 0 : i32
    %c0_i32_1 = arith.constant 0 : i32
    return %c0_i32, %c0_i32_0 : i32, i32
  }
  func.func @transform_3(%arg0: i32) -> (i32, i32) {
    %c0_i32 = arith.constant 0 : i32
    %c0_i32_0 = arith.constant 0 : i32
    %c0_i32_1 = arith.constant 0 : i32
    return %c0_i32, %c0_i32_0 : i32, i32
  }
  func.func @transform_4(%arg0: i32) -> (i32, i32, i32) {
    %c0_i32 = arith.constant 0 : i32
    %c0_i32_0 = arith.constant 0 : i32
    %c0_i32_1 = arith.constant 0 : i32
    return %arg0, %c0_i32, %c0_i32_0 : i32, i32, i32
  }
}

</mosaic_0001>

<bundles_post_ra>
// kernel: tpu_custom_call.1
= control target key start
LH: loop header
LB: loop body
LE: loop exit
PB: predicated region body
PF: predicated region fallthrough
CT: control target
= control target key end

     0   :  { %9 = vsyncpa [#allocation4], 0  ;;  %s2941_s0 = inlined_call_operand.hbm [shape: f32[2,8,8], index: 0, kind: input, shape index: {}]   ;;  %s2942_s1 = inlined_call_operand.hbm [shape: f32[8,8], index: 1, kind: input, shape index: {}]   ;;  %s2943_s2 = inlined_call_operand.hbm [shape: f32[32,128], index: 2, kind: input, shape index: {}]   ;;  %s2944_s3 = inlined_call_operand.hbm [shape: bf16[496,128], index: 3, kind: input, shape index: {}]   ;;  %s2945_s4 = inlined_call_operand.hbm [shape: f32[2,2,32], index: 4, kind: output, shape index: {}]  }
   0x1   :  { %11 = vsyncpa [#allocation4 + $0x1], 0 }
   0x2   :  { %12 = vsyncpa [#allocation7], 0 }
   0x3   :  { %13 = vsyncpa [#allocation10], 0 }
   0x4   :  { %14 = vsyncpa [#allocation5], 0 }
   0x5   :  { %16 = vsyncpa [#allocation5 + $0x1], 0  ;;  %s2624_s15 = smov 0   ;;  %s2626_s16 = smov 0  }
   0x6   :  { %s2628_s17 = smov 0   ;;  %s2630_s18 = smov 0  }
   0x7 LB: > { %s2645_s19 = sadd.s32 4294967295, %s2583_s18   ;;  %s1946_s20 = sadd.s32 4294967294, %s2583_s18   ;;  %s2583_s18 = sphi %s2630_s18, %s2969_s18   ;;  %s2579_s17 = sphi %s2628_s17, %s2968_s17   ;;  %s2575_s16 = sphi %s2626_s16, %s2967_s16   ;;  %s2571_s15 = sphi %s2624_s15, %s2966_s15  }
   0x8   : > { %p42_p0 = scmp.ne.s32.totalorder %s2575_s16, %s2571_s15  ;;  %p2946_p1 = scmp.eq.s32.totalorder %s2645_s19, 0 }
   0x9   : > { %p135_p3 = scmp.eq.s32.totalorder %s1946_s20, 1  ;;  %p1947_p5 = scmp.ge.s32.totalorder %s2583_s18, 1 }
   0xa   : > { %p2654_p4 = por %p2946_p1, %p42_p0  ;;  %p142_p7 = scmp.lt.s32.totalorder %s2583_s18, 3 }
   0xb   : > { %p2659_p6 = por %p135_p3, %p42_p0  ;;  %s2585_s24 = smov [#allocation6]  }
   0xc   : > { %s2950_s21 = scalar_select %p2654_p4, 1, 0 }
   0xd   : > { %s2951_s22 = scalar_select %p2659_p6, 1, 0 }
   0xe   : > { %p2664_p8 = pnand %p1947_p5, %p142_p7  ;;  %s155_s25 = sshll.u32 %s2585_s24, 4  ;;  %s156_s25 = int_to_ptr.vmem [resolvable:$true] %s155_s25 }
   0xf   : > { %s2586_s26 = smov [#allocation8]   ;;  %s2587_s29 = smov [#allocation9]  }
  0x10   : > { %s2952_s23 = scalar_select %p2664_p8, 1, 0 }
  0x11   : > { %p2280_p10 = pneg %p2664_p8  ;;  %s165_s27 = sshll.u32 %s2586_s26, 4  ;;  %s166_s27 = int_to_ptr.vmem [resolvable:$true] %s165_s27 }
  0x12   : > { %s178_s30 = sshll.u32 %s2587_s29, 4  ;;  %s2416_s5 = scalar_lea.vmem %s156_s25, 128  ;;  %s179_s30 = int_to_ptr.vmem [resolvable:$true] %s178_s30 }
  0x13   : > { %p2673_p11 = pnand %p2280_p10, %p2946_p1  ;;  %p2417_p13 = scmp.ne.s32.totalorder %s156_s25, %s2416_s5 }
  0x14   : > { %p2424_p5 = scmp.lt.s32.totalorder %s156_s25, %s156_s25  ;;  %p2425_p7 = scmp.lt.s32.totalorder %s2416_s5, %s2416_s5 }
  0x15   : > { %p2407_p12 = pneg %p2673_p11 }
  0x16   : > { %p2426_p9 = por %p2425_p7, %p2424_p5 }
  0x17   : > { %p2419_p0 = pnand %p2417_p13, %p2407_p12 }
  0x19   : > { %p2420_p3 = pneg %p2419_p0 }
  0x1b   : > { %p2427_p10 = pnand %p2426_p9, %p2420_p3 }
  0x1d   : > { %2430 = shalt.err (!%p2427_p10)
}
  0x1e   : > { %2283 = dma.hbm_to_vmem [thread:$0]  (!%p2673_p11), %s2942_s1, 128, %s156_s25, [#allocation7]  }
  0x1f   : > { %s2442_s8 = scalar_lea.vmem %s166_s27, 512  ;;  %p2450_p13 = scmp.lt.s32.totalorder %s166_s27, %s166_s27 }
  0x20   : > { %p2443_p1 = scmp.ne.s32.totalorder %s166_s27, %s2442_s8  ;;  %p2451_p0 = scmp.lt.s32.totalorder %s2442_s8, %s2442_s8 }
  0x22   : > { %p2445_p2 = pnand %p2443_p1, %p2407_p12  ;;  %p2452_p4 = por %p2451_p0, %p2450_p13 }
  0x24   : > { %p2446_p6 = pneg %p2445_p2 }
  0x26   : > { %p2453_p8 = pnand %p2452_p4, %p2446_p6 }
  0x28   : > { %2456 = shalt.err (!%p2453_p8)
}
  0x29   : > { %s2588_s9 = smov 128   ;;  %s2589_s10 = smov 8  }
  0x2a   : > { %2286 = dma.hbm_to_vmem [thread:$0]  (!%p2673_p11), %s2943_s2, 512, %s166_s27, [#allocation7], %s2588_s9, %s2588_s9, %s2589_s10  }
  0x2b   : > { %s2468_s13 = scalar_lea.vmem %s179_s30, 3968  ;;  %p2476_p3 = scmp.lt.s32.totalorder %s179_s30, %s179_s30 }
  0x2c   : > { %p2469_p9 = scmp.ne.s32.totalorder %s179_s30, %s2468_s13  ;;  %p2477_p5 = scmp.lt.s32.totalorder %s2468_s13, %s2468_s13 }
  0x2e   : > { %p2471_p1 = pnand %p2469_p9, %p2407_p12  ;;  %p2478_p4 = por %p2477_p5, %p2476_p3 }
  0x30   : > { %p2472_p2 = pneg %p2471_p1 }
  0x32   : > { %p2479_p6 = pnand %p2478_p4, %p2472_p2 }
  0x34   : > { %2482 = shalt.err (!%p2479_p6)
}
  0x35   : > { %s2590_s14 = smov 64   ;;  %s2591_s20 = smov 4  }
  0x36   : > { %2289 = dma.hbm_to_vmem [thread:$0]  (!%p2673_p11), %s2944_s3, 3968, %s179_s30, [#allocation10], %s2590_s14, %s2590_s14, %s2591_s20  }
  0x37   : > { %s2704_s26 = sadd.s32 1, %s2583_s18   ;;  %s29_s29 = sadd.s32 1, %s2579_s17 }
  0x38   : > { %s26_s27 = ssub.s32 %s2583_s18, %s2704_s26  ;;  %p36_p12 = scmp.ne.s32.totalorder %s2579_s17, %s2575_s16 }
  0x39   : > { %p27_p8 = scmp.eq.s32.totalorder %s26_s27, 0  ;;  %p37_p7 = scmp.eq.s32.totalorder %s2583_s18, 0 }
  0x3a   : > { %p2301_p10 = scmp.lt.s32.totalorder %s2583_s18, 2  ;;  %p2954_p0 = scmp.eq.s32.totalorder %s2645_s19, 1 }
  0x3b   : > { %s2714_s5 = scalar_select %p27_p8, %s2579_s17, %s29_s29  }
  0x3c   : > { %p38_p13 = por %p37_p7, %p36_p12  ;;  %p2718_p9 = por %p2954_p0, %p36_p12 }
  0x3d   : > { %s192_s28 = sand.u32 1, %s2579_s17   ;;  %s1953_s7 = sshll.u32 %s2583_s18, 7 }
  0x3e   : > { %s2955_s6 = scalar_select %p2718_p9, 1, 0 }
  0x3f   : > { %s1952_s30 = sshll.u32 %s192_s28, 3  ;;  %s2727_s10 = scalar_lea.hbm %s2941_s0, %s1953_s7 }
  0x40   : > { %s196_s11 = scalar_lea.vmem [#allocation3], %s1952_s30  ;;  %p2729_p11 = pnand %p2301_p10, %p38_p13 }
  0x41   : > { %s203_s12 = sshll.u32 %s196_s11, 4  ;;  %s193_s14 = scalar_lea.sflag [#allocation4], %s192_s28  ;;  %s204_s12 = int_to_ptr.vmem [resolvable:$true] %s203_s12 }
  0x42   : > { %s2483_s20 = scalar_lea.hbm %s2727_s10, 128  ;;  %p2485_p2 = pneg %p2729_p11 }
  0x43   : > { %p2484_p1 = scmp.ne.s32.totalorder %s2727_s10, %s2483_s20  ;;  %s2488_s27 = scalar_lea.hbm %s2941_s0, 256 }
  0x44   : > { %p2489_p4 = scmp.lt.s32.totalorder %s2727_s10, %s2941_s0  ;;  %p2490_p6 = scmp.lt.s32.totalorder %s2488_s27, %s2483_s20 }
  0x45   : > { %p2486_p3 = pnand %p2485_p2, %p2484_p1 }
  0x46   : > { %p2491_p8 = por %p2490_p6, %p2489_p4 }
  0x47   : > { %p2487_p5 = pneg %p2486_p3 }
  0x49   : > { %p2492_p12 = pnand %p2491_p8, %p2487_p5 }
  0x4b   : > { %2495 = shalt.err (!%p2492_p12)
}
  0x4c   : > { %s2496_s30 = scalar_lea.vmem %s204_s12, 128  ;;  %s2592_s28 = smov [#allocation3]  }
  0x4d   : > { %p2497_p7 = scmp.ne.s32.totalorder %s204_s12, %s2496_s30  ;;  %s2501_s8 = sshll.u32 %s2592_s28, 4  ;;  %s2502_s8 = int_to_ptr.vmem [resolvable:$false] %s2501_s8 }
  0x4e   : > { %s2503_s9 = scalar_lea.vmem %s2502_s8, 256  ;;  %p2504_p0 = scmp.lt.s32.totalorder %s204_s12, %s2502_s8 }
  0x4f   : > { %p2499_p10 = pnand %p2497_p7, %p2485_p2  ;;  %p2505_p1 = scmp.lt.s32.totalorder %s2503_s9, %s2496_s30 }
  0x51   : > { %p2500_p13 = pneg %p2499_p10  ;;  %p2506_p3 = por %p2505_p1, %p2504_p0 }
  0x53   : > { %p2507_p9 = pnand %p2506_p3, %p2500_p13 }
  0x55   : > { %2510 = shalt.err (!%p2507_p9)
}
  0x56   : > { %2293 = dma.hbm_to_vmem [thread:$0]  (!%p2729_p11), %s2727_s10, 128, %s204_s12, %s193_s14  }
  0x57   : > { %p2957_p5 = scmp.ne.s32.totalorder %s2952_s23, 0 }
  0x58   : > { %s2750_s11 = sand.u32 (!%p2957_p5), 1, %s2575_s16   ;;  %p2958_p2 = scmp.ne.s32.totalorder (!%p2957_p5), %s2950_s21, 0 }
  0x59   : > { %212 = sbr.rel (%p2957_p5) target bundleno = 7522 (0x1d62), region = 36  ;;  %s1955_s20 = sshll.u32 (!%p2957_p5), %s2750_s11, 3 }
  0x5a   : > { %s215_s24 = scalar_lea.sflag (!%p2957_p5), [#allocation4], %s2750_s11  ;;  %s218_s25 = scalar_lea.vmem (!%p2957_p5), [#allocation3], %s1955_s20 }
  0x5e   : > { %2554 = dma.done.wait (%p2958_p2), %s215_s24, 128  }
  0x5f   : > { %2556 = vsyncadd (%p2958_p2), %s215_s24, 4294967168  ;;  %p2959_p9 = scmp.eq.s32.totalorder %s2645_s19, 0 }
  0x61   : > { %2558 = dma.done.wait (%p2959_p9), [#allocation7], 640   ;;  %p2960_p11 = pmov %p2959_p9 }
  0x62   : > { %p2961_p4 = pmov %p2959_p9 }
  0x63   : > { %2560 = vsyncadd (%p2960_p11), [#allocation7], 4294966656 }
  0x64   : > { %2562 = dma.done.wait (%p2961_p4), [#allocation10], 3968   ;;  %p2962_p6 = pmov %p2961_p4 }
  0x65   : > { %v2593_v0 = vmov 0.0   ;;  %vm2594_vm0 = vmmov 0   ;;  %vm268_vm1 = vcmask 1043456   ;;  %v257_v1 = vld [vmem:[#allocation9] sm:$0xf]  ;;  %v256_v2 = vld [vmem:[%s218_s25] sm:$0xff] }
  0x66   : > { %2564 = vsyncadd (%p2962_p6), [#allocation10], 4294963328  ;;  %2098 = vmatprep.subr.bf16.mxu0 %v2593_v0  ;;  %2100 = vmatprep.mubr.msk.bf16.mxu0 %vm2594_vm0, %v2593_v0  ;;  %v270_v3 = vsel %vm268_vm1, %v257_v1, 0  ;;  %v258_v4 = vpack.c.bf16 %v256_v2, %v256_v2  ;;  %vm264_vm2 = vcmask 64512   ;;  %v314_v5 = vld [vmem:[#allocation9 + $0x8] sm:$0xf] }
  0x67   : > { %2116 = vmatprep.subr.bf16.mxu1 %v2593_v0  ;;  %2118 = vmatprep.mubr.msk.bf16.mxu1 %vm2594_vm0, %v2593_v0  ;;  %v325_v6 = vsel %vm268_vm1, %v314_v5, 0  ;;  %v1960_v7 = vld [vmem:[#allocation8] ss:$0 sm:$0xff]  ;;  %v312_v9 = vld [vmem:[#allocation6] sm:$0xff]  ;;  %v1962_v16 = vld [vmem:[#allocation8 + $0x1] ss:$0 sm:$0xff] }
  0x68   : > { %2099 = vmatpush3.bf16.msra.mxu0 %v270_v3  ;;  %s2595_s21 = smov 120   ;;  %v474_v36 = vld [vmem:[#allocation9 + $0x10] sm:$0xf]  ;;  %v1966_v47 = vld [vmem:[#allocation8 + $0x2] ss:$0 sm:$0xff]  ;;  %vm638_vm3 = vcmask 261120  }
  0x69   : > { %2104 = vmatprep.subr.bf16.mxu0 %v2593_v0  ;;  %v485_v37 = vsel %vm268_vm1, %v474_v36, 0  ;;  %v554_v60 = vld [vmem:[#allocation9 + $0x18] sm:$0xf]  ;;  %v1968_v3 = vld [vmem:[#allocation8 + $0x3] ss:$0 sm:$0xff]  ;;  %vm828_vm4 = vcmask 130048  }
  0x6a   : > { %v565_v61 = vsel %vm268_vm1, %v554_v60, 0  ;;  %v1969_v5 = vld [vmem:[#allocation8 + $0x4] ss:$0 sm:$0xff]  ;;  %v1980_v60 = vld [vmem:[#allocation8 + $0x9] ss:$0 sm:$0xff]  ;;  %s2596_s23 = smov 112  }
  0x6b   : > { %2101 = vmatmul.mubr.msk.bf16.vlgmr.msra.gmra.mxu0 %vm264_vm2, %v258_v4  ;;  %vm939_vm5 = vcmask 1041408   ;;  %vm922_vm6 = vcmask 27648   ;;  %vm935_vm7 = vcmask 31744   ;;  %vm1042_vm8 = vcmask 125952   ;;  %s2597_s10 = smov 96   ;;  %s1959_s12 = sshll.u32 %s2750_s11, 1 }
  0x6c   : > { %2106 = vmatprep.mubr.msk.bf16.mxu0 %vm2594_vm0, %v2593_v0  ;;  %2105 = vmatpush3.bf16.msra.mxu0 %v325_v6  ;;  %vm1171_vm9 = vcmask 523264   ;;  %vm1486_vm10 = vcmask 1040384   ;;  %vm1469_vm11 = vcmask 9216   ;;  %vm1482_vm12 = vcmask 15360   ;;  %s2035_s13 = sshll.u32 %s2645_s19, 5  ;;  %s254_s14 = scalar_lea.vmem [#allocation11], %s1959_s12 }
  0x6d   : > { %2110 = vmatprep.subr.bf16.mxu0 %v2593_v0  ;;  %vm1597_vm13 = vcmask 254976   ;;  %s1847_s27 = sshll.u32 %s254_s14, 4  ;;  %s1845_s30 = scalar_lea.hbm %s2945_s4, %s2035_s13  ;;  %s1848_s27 = int_to_ptr.vmem [resolvable:$true] %s1847_s27 }
  0x6e   : > { %s1834_s28 = scalar_lea.sflag [#allocation5], %s2750_s11  ;;  %s2511_s8 = scalar_lea.vmem %s1848_s27, 32 }
  0x6f   : > { %p2512_p8 = scmp.ne.s32.totalorder %s1848_s27, %s2511_s8  ;;  %p2963_p12 = scmp.ne.s32.totalorder %s2955_s6, 0 }
  0x70   : > { %s2598_s9 = smov [#allocation11]  }
  0x71   : > { %p2513_p7 = pnand %p2512_p8, %p2963_p12  ;;  %s2515_s20 = sshll.u32 %s2598_s9, 4  ;;  %s2516_s20 = int_to_ptr.vmem [resolvable:$false] %s2515_s20 }
  0x72   : > { %s2517_s19 = scalar_lea.vmem %s2516_s20, 64  ;;  %p2518_p13 = scmp.lt.s32.totalorder %s1848_s27, %s2516_s20 }
  0x73   : > { %p2514_p10 = pneg %p2513_p7  ;;  %p2519_p0 = scmp.lt.s32.totalorder %s2517_s19, %s2511_s8 }
  0x75   : > { %p2520_p1 = por %p2519_p0, %p2518_p13 }
  0x77   : > { %p2521_p3 = pnand %p2520_p1, %p2514_p10 }
 0x12b   : > { %v306_v8 = vpop.f32.mrf.mxu0 }
 0x12c   : > { %v307_v10 = vadd.f32 %v1960_v7, %v306_v8 }
 0x12d   : > { %v2102_v11 = vpop.f32.mrf.mxu0 }
 0x12e   : > { %v313_v12 = vadd.f32 %v312_v9, %v307_v10  ;;  %v2350_v9 = vld [vmem:[#allocation9 + $0x28] sm:$0xff]   ;;  %v2351_v10 = vld [vmem:[#allocation9 + $0x20] sm:$0xff]  }
 0x12f   : > { %v309_v13 = vpop.f32.mrf.mxu0  ;;  %v1970_v11 = vld [vmem:[#allocation8 + $0x5] ss:$0 sm:$0xff] }
 0x130   : > { %v315_v14 = vpack.c.bf16 %v313_v12, %v313_v12 }
 0x131   : > { %v2103_v15 = vpop.f32.mrf.mxu0 }
 0x132   : > { %2107 = vmatmul.mubr.msk.bf16.vlgmr.msra.gmra.mxu0 %vm264_vm2, %v315_v14 }
 0x133   : > { %2112 = vmatprep.mubr.msk.bf16.mxu0 %vm2594_vm0, %v2593_v0 }
 0x1f2   : > { %v361_v17 = vpop.f32.mrf.mxu0 }
 0x1f3   : > { %v362_v18 = vadd.f32 %v1962_v16, %v361_v17 }
 0x1f4   : > { %v2108_v19 = vpop.f32.mrf.mxu0 }
 0x1f5   : > { %v367_v20 = vpack.c.bf16 %v362_v18, %v362_v18 }
 0x1f6   : > { %v364_v21 = vpop.f32.mrf.mxu0 }
 0x1f7   : > { %369 = vrot.lane.b32.xlu0 %v367_v20, %s2595_s21 }
 0x1f8   : > { %v2109_v22 = vpop.f32.mrf.mxu0 }
 0x269   : > { %v370_v23 = vpop.permute.xlu0 %369 }
 0x26a   : > { %v375_v24 = vsel %vm264_vm2, %v370_v23, 0  ;;  %v432_v25 = vsel %vm268_vm1, %v370_v23, 0 }
 0x26b   : > { %2111 = vmatpush3.bf16.xpose.msra.mxu0 %v375_v24  ;;  %2117 = vmatpush3.bf16.msra.mxu1 %v432_v25 }
 0x26c   : > { %2122 = vmatprep.subr.bf16.mxu0 %v2593_v0  ;;  %2128 = vmatprep.subr.bf16.mxu1 %v2593_v0 }
 0x272   : > { %2113 = vmatmul.mubr.msk.bf16.vlgmr.msra.gmra.mxu0 %vm264_vm2, %v367_v20 }
 0x273   : > { %2124 = vmatprep.mubr.msk.bf16.mxu0 %vm2594_vm0, %v2593_v0  ;;  %2123 = vmatpush3.bf16.msra.mxu0 %v485_v37 }
 0x274   : > { %2134 = vmatprep.subr.bf16.mxu0 %v2593_v0 }
 0x332   : > { %v411_v26 = vpop.f32.mrf.mxu0 }
 0x333   : > { %v417_v27 = vsel %vm264_vm2, %v411_v26, -inf }
 0x334   : > { %418 = vmax.xlane.f32.xlu0 %v417_v27  ;;  %v2114_v28 = vpop.f32.mrf.mxu0  ;;  %v1972_v27 = vld [vmem:[#allocation8 + $0x6] ss:$0 sm:$0xff] }
 0x336   : > { %v414_v29 = vpop.f32.mrf.mxu0 }
 0x338   : > { %v2115_v30 = vpop.f32.mrf.mxu0 }
 0x3bd   : > { %v419_v31 = vpop.xlane.xlu0 %418 }
 0x3be   : > { %v420_v32 = vsub.f32 %v411_v26, %v419_v31 }
 0x3c0   : > { %v421_v33 = vmul.f32 1.442695, %v420_v32 }
 0x3c2   : > { %2375 = vpow2.f32 %v421_v33 }
 0x3cf   : > { %v2376_v34 = vpop.eup %2375 }
 0x3d0   : > { %v423_v35 = vsel %vm264_vm2, %v2376_v34, 0.0 }
 0x3d1   : > { %424 = vadd.xlane.f32.xlu1 %v423_v35 }
 0x45a   : > { %v425_v38 = vpop.xlane.xlu1 %424 }
 0x45b   : > { %2377 = vrcp.f32 %v425_v38 }
 0x468   : > { %v2378_v39 = vpop.eup %2377 }
 0x469   : > { %v427_v40 = vmul.f32 %v2378_v39, %v2376_v34 }
 0x46b   : > { %v428_v41 = vpack.c.bf16 %v427_v40, %v427_v40  ;;  %v714_v40 = vld [vmem:[#allocation9 + $0x38] sm:$0xf] }
 0x46d   : > { %2119 = vmatmul.mubr.msk.bf16.vlgmr.msra.gmra.mxu1 %vm264_vm2, %v428_v41  ;;  %v712_v41 = vld [vmem:[#allocation9 + $0x30] sm:$0xf] }
 0x46e   : > { %2130 = vmatprep.mubr.msk.bf16.mxu1 %vm2594_vm0, %v2593_v0  ;;  %2129 = vmatpush3.bf16.msra.mxu1 %v565_v61 }
 0x46f   : > { %2142 = vmatprep.subr.bf16.mxu1 %v2593_v0 }
 0x52d   : > { %v468_v42 = vpop.f32.mrf.mxu1 }
 0x52e   : > { %v475_v43 = vpack.c.bf16 %v468_v42, %v468_v42  ;;  %v720_v42 = vsel %vm268_vm1, %v714_v40, 0 }
 0x52f   : > { %v2120_v44 = vpop.f32.mrf.mxu1 }
 0x530   : > { %2125 = vmatmul.mubr.msk.bf16.vlgmr.msra.gmra.mxu0 %vm264_vm2, %v475_v43  ;;  %v766_v43 = vsel %vm268_vm1, %v712_v41, 0 }
 0x531   : > { %v471_v45 = vpop.f32.mrf.mxu1  ;;  %2138 = vmatprep.mubr.msk.bf16.mxu0 %vm2594_vm0, %v2593_v0  ;;  %2135 = vmatpush3.bf16.msra.mxu0 %v2350_v9 }
 0x532   : > { %2136 = vmatprep.subr.bf16.mxu0 %v2593_v0 }
 0x533   : > { %v2121_v46 = vpop.f32.mrf.mxu1 }
 0x535   : > { %2137 = vmatpush3.bf16.msra.mxu0 %v2351_v10 }
 0x536   : > { %2148 = vmatprep.subr.bf16.mxu0 %v2593_v0 }
 0x5f0   : > { %v521_v48 = vpop.f32.mrf.mxu0 }
 0x5f1   : > { %v522_v49 = vadd.f32 %v1966_v47, %v521_v48  ;;  %v1976_v48 = vld [vmem:[#allocation8 + $0x7] ss:$0 sm:$0xff] }
 0x5f2   : > { %v2126_v50 = vpop.f32.mrf.mxu0 }
 0x5f3   : > { %v527_v51 = vadd.f32 %v522_v49, %v313_v12  ;;  %v1977_v50 = vld [vmem:[#allocation8 + $0x8] ss:$0 sm:$0xff] }
 0x5f4   : > { %v524_v52 = vpop.f32.mrf.mxu0 }
 0x5f5   : > { %v530_v53 = vsel %vm264_vm2, %v527_v51, 0.0 }
 0x5f6   : > { %531 = vadd.xlane.f32.xlu1 %v530_v53  ;;  %v2127_v54 = vpop.f32.mrf.mxu0 }
 0x67f   : > { %v532_v55 = vpop.xlane.xlu1 %531 }
 0x680   : > { %v534_v56 = vmul.f32 0.125, %v532_v55 }
 0x682   : > { %v535_v57 = vsub.f32 %v527_v51, %v534_v56 }
 0x684   : > { %v536_v58 = vmul.f32 %v535_v57, %v535_v57 }
 0x686   : > { %v537_v59 = vsel %vm264_vm2, %v536_v58, 0.0 }
 0x687   : > { %538 = vadd.xlane.f32.xlu1 %v537_v59 }
 0x710   : > { %v539_v62 = vpop.xlane.xlu1 %538 }
 0x711   : > { %v540_v63 = vmul.f32 0.125, %v539_v62 }
 0x713   : > { %v541_v1 = vadd.f32 1e-05, %v540_v63 }
 0x715   : > { %2379 = vrsqrt.f32 %v541_v1 }
 0x722   : > { %v2380_v2 = vpop.eup %2379 }
 0x723   : > { %v543_v4 = vmul.f32 %v2380_v2, %v535_v57  ;;  %v2352_v57 = vld [vmem:[#allocation9 + $0x40] sm:$0xff]  }
 0x725   : > { %v548_v6 = vmul.f32 %v1968_v3, %v543_v4 }
 0x727   : > { %v553_v7 = vadd.f32 %v1969_v5, %v548_v6 }
 0x729   : > { %v555_v8 = vpack.c.bf16 %v553_v7, %v553_v7 }
 0x72b   : > { %2131 = vmatmul.mubr.msk.bf16.vlgmr.msra.gmra.mxu1 %vm264_vm2, %v555_v8 }
 0x72c   : > { %2144 = vmatprep.mubr.msk.bf16.mxu1 %vm2594_vm0, %v2593_v0  ;;  %2143 = vmatpush3.bf16.msra.mxu1 %v720_v42 }
 0x72d   : > { %2154 = vmatprep.subr.bf16.mxu1 %v2593_v0 }
 0x7eb   : > { %v601_v12 = vpop.f32.mrf.mxu1 }
 0x7ec   : > { %v602_v13 = vadd.f32 %v1970_v11, %v601_v12 }
 0x7ed   : > { %v2132_v14 = vpop.f32.mrf.mxu1 }
 0x7ee   : > { %v608_v15 = vmul.f32 0.044715, %v602_v13  ;;  %v607_v23 = vmul.f32 0.5, %v602_v13 }
 0x7ef   : > { %v604_v16 = vpop.f32.mrf.mxu1 }
 0x7f0   : > { %v609_v17 = vmul.f32 %v608_v15, %v602_v13 }
 0x7f1   : > { %v2133_v18 = vpop.f32.mrf.mxu1 }
 0x7f2   : > { %v610_v19 = vmul.f32 %v609_v17, %v602_v13 }
 0x7f4   : > { %v611_v20 = vadd.f32 %v610_v19, %v602_v13 }
 0x7f6   : > { %v612_v21 = vmul.f32 0.7978846, %v611_v20 }
 0x7f8   : > { %2381 = vtanh.f32 %v612_v21 }
 0x805   : > { %v2382_v22 = vpop.eup %2381 }
 0x806   : > { %v614_v24 = vadd.f32 1.0, %v2382_v22 }
 0x808   : > { %v615_v25 = vmul.f32 %v614_v24, %v607_v23 }
 0x80a   : > { %v620_v26 = vpack.c.bf16 %v615_v25, %v615_v25 }
 0x80c   : > { %2139 = vmatmul.mubr.msk.bf16.vlgmr.msra.gmra.mxu0 %vm638_vm3, %v620_v26 }
 0x80d   : > { %2150 = vmatprep.mubr.msk.bf16.mxu0 %vm2594_vm0, %v2593_v0  ;;  %2149 = vmatpush3.bf16.msra.mxu0 %v766_v43 }
 0x80e   : > { %2160 = vmatprep.subr.bf16.mxu0 %v2593_v0 }
 0x8cc   : > { %v676_v28 = vpop.f32.mrf.mxu0 }
 0x8cd   : > { %v677_v29 = vadd.f32 %v1972_v27, %v676_v28  ;;  %v2353_v27 = vld [vmem:[#allocation9 + $0x48] sm:$0xff]  }
 0x8ce   : > { %v2140_v30 = vpop.f32.mrf.mxu0 }
 0x8cf   : > { %v682_v31 = vadd.f32 %v677_v29, %v553_v7  ;;  %v1981_v7 = vld [vmem:[#allocation8 + $0xa] ss:$0 sm:$0xff] }
 0x8d0   : > { %v679_v32 = vpop.f32.mrf.mxu0 }
 0x8d1   : > { %v685_v33 = vsel %vm264_vm2, %v682_v31, 0.0 }
 0x8d2   : > { %686 = vadd.xlane.f32.xlu1 %v685_v33  ;;  %v2141_v34 = vpop.f32.mrf.mxu0 }
 0x95b   : > { %v687_v35 = vpop.xlane.xlu1 %686 }
 0x95c   : > { %v688_v36 = vmul.f32 0.125, %v687_v35 }
 0x95e   : > { %v689_v37 = vsub.f32 %v682_v31, %v688_v36 }
 0x960   : > { %v690_v38 = vmul.f32 %v689_v37, %v689_v37 }
 0x962   : > { %v691_v39 = vsel %vm264_vm2, %v690_v38, 0.0 }
 0x963   : > { %692 = vadd.xlane.f32.xlu1 %v691_v39 }
 0x9ec   : > { %v693_v44 = vpop.xlane.xlu1 %692 }
 0x9ed   : > { %v694_v45 = vmul.f32 0.125, %v693_v44 }
 0x9ef   : > { %v695_v46 = vadd.f32 1e-05, %v694_v45 }
 0x9f1   : > { %2383 = vrsqrt.f32 %v695_v46 }
 0x9fe   : > { %v2384_v47 = vpop.eup %2383 }
 0x9ff   : > { %v697_v49 = vmul.f32 %v2384_v47, %v689_v37  ;;  %v1986_v37 = vld [vmem:[#allocation8 + $0xb] ss:$0 sm:$0xff] }
 0xa01   : > { %v702_v51 = vmul.f32 %v1976_v48, %v697_v49 }
 0xa03   : > { %v707_v52 = vadd.f32 %v1977_v50, %v702_v51  ;;  %v2354_v50 = vld [vmem:[#allocation9 + $0x50] sm:$0xff]  }
 0xa05   : > { %708 = vst.msk [vmem:[#allocation2] sm:$0xff] %vm264_vm2, %v707_v52 }
 0xa0c   : > { %v711_v53 = vld [vmem:[#allocation2 + $0x1] ss:$2 sm:$0xf]  ;;  %v709_v54 = vld [vmem:[#allocation2] ss:$2 sm:$0xf] }
 0xa0d   : > { %v715_v55 = vpack.c.bf16 %v711_v53, %v711_v53  ;;  %v713_v56 = vpack.c.bf16 %v709_v54, %v709_v54 }
 0xa0f   : > { %2145 = vmatmul.mubr.msk.bf16.vlgmr.msra.gmra.mxu1 %vm264_vm2, %v715_v55  ;;  %2151 = vmatmul.mubr.msk.bf16.vlgmr.msra.gmra.mxu0 %vm264_vm2, %v713_v56  ;;  %v1989_v55 = vld [vmem:[#allocation8 + $0xc] ss:$0 sm:$0xff] }
 0xa10   : > { %2156 = vmatprep.mubr.msk.bf16.mxu1 %vm2594_vm0, %v2593_v0  ;;  %2162 = vmatprep.mubr.msk.bf16.mxu0 %vm2594_vm0, %v2593_v0 }
 0xa11   : > { %2155 = vmatpush3.bf16.msra.mxu1 %v2352_v57  ;;  %v1990_v57 = vld [vmem:[#allocation8 + $0xd] ss:$0 sm:$0xff] }
 0xa12   : > { %2166 = vmatprep.subr.bf16.mxu1 %v2593_v0 }
 0xacf   : > { %v756_v58 = vpop.f32.mrf.mxu1  ;;  %v802_v59 = vpop.f32.mrf.mxu0 }
 0xad0   : > { %v803_v61 = vadd.f32 %v802_v59, %v756_v58 }
 0xad1   : > { %v2146_v62 = vpop.f32.mrf.mxu1  ;;  %v2152_v63 = vpop.f32.mrf.mxu0 }
 0xad2   : > { %v2825_v1 = vadd.f32 %v1980_v60, %v803_v61  ;;  %v2355_v61 = vld [vmem:[#allocation9 + $0x70] sm:$0xff]   ;;  %v2356_v62 = vld [vmem:[#allocation9 + $0x68] sm:$0xff]   ;;  %v2357_v63 = vld [vmem:[#allocation9 + $0x60] sm:$0xff]  }
 0xad3   : > { %v759_v2 = vpop.f32.mrf.mxu1  ;;  %v805_v3 = vpop.f32.mrf.mxu0 }
 0xad4   : > { %v816_v4 = vpack.c.bf16 %v2825_v1, %v2825_v1  ;;  %v1991_v2 = vld [vmem:[#allocation8 + $0xe] ss:$0 sm:$0xff] }
 0xad5   : > { %v2147_v5 = vpop.f32.mrf.mxu1  ;;  %v2153_v6 = vpop.f32.mrf.mxu0 }
 0xad6   : > { %2157 = vmatmul.mubr.msk.bf16.vlgmr.msra.gmra.mxu1 %vm828_vm4, %v816_v4 }
 0xad7   : > { %2168 = vmatprep.mubr.msk.bf16.mxu1 %vm2594_vm0, %v2593_v0 }
 0xb96   : > { %v866_v8 = vpop.f32.mrf.mxu1 }
 0xb97   : > { %v867_v9 = vadd.f32 %v1981_v7, %v866_v8 }
 0xb98   : > { %v2158_v10 = vpop.f32.mrf.mxu1 }
 0xb99   : > { %v872_v11 = vpack.c.bf16 %v867_v9, %v867_v9 }
 0xb9a   : > { %v869_v12 = vpop.f32.mrf.mxu1 }
 0xb9b   : > { %874 = vrot.lane.b32.xlu1 %v872_v11, %s2596_s23 }
 0xb9c   : > { %v2159_v13 = vpop.f32.mrf.mxu1 }
 0xc0d   : > { %v875_v14 = vpop.permute.xlu1 %874 }
 0xc0e   : > { %v880_v15 = vsel %vm828_vm4, %v875_v14, 0  ;;  %v940_v16 = vsel %vm939_vm5, %v875_v14, 0 }
 0xc0f   : > { %2161 = vmatpush3.bf16.xpose.msra.mxu0 %v880_v15  ;;  %2167 = vmatpush3.bf16.msra.mxu1 %v940_v16 }
 0xc10   : > { %2172 = vmatprep.subr.bf16.mxu0 %v2593_v0  ;;  %2178 = vmatprep.subr.bf16.mxu1 %v2593_v0 }
 0xc16   : > { %2163 = vmatmul.mubr.msk.bf16.vlgmr.msra.gmra.mxu0 %vm828_vm4, %v872_v11 }
 0xc17   : > { %2174 = vmatprep.mubr.msk.bf16.mxu0 %vm2594_vm0, %v2593_v0  ;;  %2173 = vmatpush3.bf16.msra.mxu0 %v2353_v27 }
 0xc18   : > { %2184 = vmatprep.subr.bf16.mxu0 %v2593_v0 }
 0xcd6   : > { %v916_v17 = vpop.f32.mrf.mxu0 }
 0xcd7   : > { %v923_v18 = vsel %vm922_vm6, %v916_v17, -inf }
 0xcd8   : > { %924 = vmax.xlane.f32.xlu0 %v923_v18  ;;  %v2164_v19 = vpop.f32.mrf.mxu0  ;;  %v1994_v18 = vld [vmem:[#allocation8 + $0xf] ss:$0 sm:$0xff] }
 0xcda   : > { %v919_v20 = vpop.f32.mrf.mxu0 }
 0xcdc   : > { %v2165_v21 = vpop.f32.mrf.mxu0 }
 0xd61   : > { %v925_v22 = vpop.xlane.xlu0 %924 }
 0xd62   : > { %v926_v23 = vsub.f32 %v916_v17, %v925_v22 }
 0xd64   : > { %v927_v24 = vmul.f32 1.442695, %v926_v23 }
 0xd66   : > { %2385 = vpow2.f32 %v927_v24 }
 0xd73   : > { %v2386_v25 = vpop.eup %2385 }
 0xd74   : > { %v929_v26 = vsel %vm922_vm6, %v2386_v25, 0.0 }
 0xd75   : > { %930 = vadd.xlane.f32.xlu1 %v929_v26 }
 0xdfe   : > { %v931_v28 = vpop.xlane.xlu1 %930 }
 0xdff   : > { %2387 = vrcp.f32 %v931_v28 }
 0xe0c   : > { %v2388_v29 = vpop.eup %2387 }
 0xe0d   : > { %v933_v30 = vmul.f32 %v2388_v29, %v2386_v25 }
 0xe0f   : > { %v934_v31 = vpack.c.bf16 %v933_v30, %v933_v30 }
 0xe11   : > { %2169 = vmatmul.mubr.msk.bf16.vlgmr.msra.gmra.mxu1 %vm935_vm7, %v934_v31  ;;  %v2359_v31 = vld [vmem:[#allocation9 + $0x80] sm:$0xff]  }
 0xe12   : > { %2180 = vmatprep.mubr.msk.bf16.mxu1 %vm2594_vm0, %v2593_v0  ;;  %2179 = vmatpush3.bf16.msra.mxu1 %v2354_v50 }
 0xe13   : > { %2196 = vmatprep.subr.bf16.mxu1 %v2593_v0 }
 0xed1   : > { %v976_v32 = vpop.f32.mrf.mxu1 }
 0xed2   : > { %v984_v33 = vpack.c.bf16 %v976_v32, %v976_v32 }
 0xed3   : > { %v2170_v34 = vpop.f32.mrf.mxu1 }
 0xed4   : > { %2175 = vmatmul.mubr.msk.bf16.vlgmr.msra.gmra.mxu0 %vm828_vm4, %v984_v33 }
 0xed5   : > { %v979_v35 = vpop.f32.mrf.mxu1  ;;  %2192 = vmatprep.mubr.msk.bf16.mxu0 %vm2594_vm0, %v2593_v0  ;;  %2185 = vmatpush3.bf16.msra.mxu0 %v2355_v61 }
 0xed6   : > { %2186 = vmatprep.subr.bf16.mxu0 %v2593_v0 }
 0xed7   : > { %v2171_v36 = vpop.f32.mrf.mxu1 }
 0xed8   : > { %v2000_v36 = vld [vmem:[#allocation8 + $0x10] ss:$0 sm:$0xff] }
 0xed9   : > { %2187 = vmatpush3.bf16.msra.mxu0 %v2356_v62 }
 0xeda   : > { %2188 = vmatprep.subr.bf16.mxu0 %v2593_v0 }
 0xedd   : > { %2189 = vmatpush3.bf16.msra.mxu0 %v2357_v63 }
 0xede   : > { %2190 = vmatprep.subr.bf16.mxu0 %v2593_v0 }
 0xf94   : > { %v1033_v38 = vpop.f32.mrf.mxu0 }
 0xf95   : > { %v1034_v39 = vadd.f32 %v1986_v37, %v1033_v38  ;;  %v2001_v38 = vld [vmem:[#allocation8 + $0x11] ss:$0 sm:$0xff] }
 0xf96   : > { %v2176_v40 = vpop.f32.mrf.mxu0 }
 0xf97   : > { %v1039_v41 = vadd.f32 %v1034_v39, %v2825_v1  ;;  %v2358_v1 = vld [vmem:[#allocation9 + $0x58] sm:$0xff]  }
 0xf98   : > { %v1036_v42 = vpop.f32.mrf.mxu0  ;;  %2191 = vmatpush3.bf16.msra.mxu0 %v2358_v1 }
 0xf99   : > { %v1043_v43 = vsel %vm1042_vm8, %v1039_v41, 0.0  ;;  %2208 = vmatprep.subr.bf16.mxu0 %v2593_v0  ;;  %v2360_v42 = vld [vmem:[#allocation9 + $0x78] sm:$0xff]  }
 0xf9a   : > { %1044 = vadd.xlane.f32.xlu0 %v1043_v43  ;;  %v2177_v44 = vpop.f32.mrf.mxu0 }
0x1023   : > { %v1045_v45 = vpop.xlane.xlu0 %1044 }
0x1024   : > { %v1047_v46 = vmul.f32 0.0625, %v1045_v45 }
0x1026   : > { %v1048_v47 = vsub.f32 %v1039_v41, %v1047_v46  ;;  %v2361_v46 = vld [vmem:[#allocation9 + $0x90] sm:$0xff]  }
0x1028   : > { %v1049_v48 = vmul.f32 %v1048_v47, %v1048_v47 }
0x102a   : > { %v1050_v49 = vsel %vm1042_vm8, %v1049_v48, 0.0 }
0x102b   : > { %1051 = vadd.xlane.f32.xlu0 %v1050_v49 }
0x10b4   : > { %v1052_v51 = vpop.xlane.xlu0 %1051 }
0x10b5   : > { %v1053_v52 = vmul.f32 0.0625, %v1052_v51 }
0x10b7   : > { %v1054_v53 = vadd.f32 1e-05, %v1053_v52 }
0x10b9   : > { %2389 = vrsqrt.f32 %v1054_v53  ;;  %v2006_v53 = vld [vmem:[#allocation8 + $0x12] ss:$0 sm:$0xff] }
0x10c6   : > { %v2390_v54 = vpop.eup %2389 }
0x10c7   : > { %v1056_v56 = vmul.f32 %v2390_v54, %v1048_v47  ;;  %v2362_v47 = vld [vmem:[#allocation9 + $0x88] sm:$0xff]  }
0x10c9   : > { %v1061_v58 = vmul.f32 %v1989_v55, %v1056_v56 }
0x10cb   : > { %v1066_v59 = vadd.f32 %v1990_v57, %v1061_v58 }
0x10cd   : > { %v1069_v60 = vpack.c.bf16 %v1066_v59, %v1066_v59 }
0x10cf   : > { %2181 = vmatmul.mubr.msk.bf16.vlgmr.msra.gmra.mxu1 %vm828_vm4, %v1069_v60  ;;  %v2007_v60 = vld [vmem:[#allocation8 + $0x13] ss:$0 sm:$0xff] }
0x10d0   : > { %2198 = vmatprep.mubr.msk.bf16.mxu1 %vm2594_vm0, %v2593_v0  ;;  %2197 = vmatpush3.bf16.msra.mxu1 %v2359_v31 }
0x10d1   : > { %2202 = vmatprep.subr.bf16.mxu1 %v2593_v0 }
0x118f   : > { %v1118_v3 = vpop.f32.mrf.mxu1 }
0x1190   : > { %v1119_v4 = vadd.f32 %v1991_v2, %v1118_v3 }
0x1191   : > { %v2182_v5 = vpop.f32.mrf.mxu1 }
0x1192   : > { %v1125_v6 = vmul.f32 0.044715, %v1119_v4  ;;  %v1124_v14 = vmul.f32 0.5, %v1119_v4 }
0x1193   : > { %v1121_v7 = vpop.f32.mrf.mxu1 }
0x1194   : > { %v1126_v8 = vmul.f32 %v1125_v6, %v1119_v4 }
0x1195   : > { %v2183_v9 = vpop.f32.mrf.mxu1 }
0x1196   : > { %v1127_v10 = vmul.f32 %v1126_v8, %v1119_v4 }
0x1198   : > { %v1128_v11 = vadd.f32 %v1127_v10, %v1119_v4 }
0x119a   : > { %v1129_v12 = vmul.f32 0.7978846, %v1128_v11 }
0x119c   : > { %2391 = vtanh.f32 %v1129_v12 }
0x11a9   : > { %v2392_v13 = vpop.eup %2391 }
0x11aa   : > { %v1131_v15 = vadd.f32 1.0, %v2392_v13 }
0x11ac   : > { %v1132_v16 = vmul.f32 %v1131_v15, %v1124_v14 }
0x11ae   : > { %v1141_v17 = vpack.c.bf16 %v1132_v16, %v1132_v16 }
0x11b0   : > { %2193 = vmatmul.mubr.msk.bf16.vlgmr.msra.gmra.mxu0 %vm1171_vm9, %v1141_v17  ;;  %v2363_v17 = vld [vmem:[#allocation9 + $0xa0] sm:$0xff]  }
0x11b1   : > { %2212 = vmatprep.mubr.msk.bf16.mxu0 %vm2594_vm0, %v2593_v0  ;;  %2209 = vmatpush3.bf16.msra.mxu0 %v2361_v46 }
0x11b2   : > { %2210 = vmatprep.subr.bf16.mxu0 %v2593_v0 }
0x11b5   : > { %2211 = vmatpush3.bf16.msra.mxu0 %v2362_v47  ;;  %v2017_v47 = vld [vmem:[#allocation8 + $0x15] ss:$0 sm:$0xff] }
0x11b6   : > { %2222 = vmatprep.subr.bf16.mxu0 %v2593_v0 }
0x1270   : > { %v1209_v19 = vpop.f32.mrf.mxu0 }
0x1271   : > { %v1210_v20 = vadd.f32 %v1994_v18, %v1209_v19 }
0x1272   : > { %v2194_v21 = vpop.f32.mrf.mxu0 }
0x1273   : > { %v1215_v22 = vadd.f32 %v1210_v20, %v1066_v59 }
0x1274   : > { %v1212_v23 = vpop.f32.mrf.mxu0 }
0x1275   : > { %v1218_v24 = vsel %vm1042_vm8, %v1215_v22, 0.0 }
0x1276   : > { %1219 = vadd.xlane.f32.xlu0 %v1218_v24  ;;  %v2195_v25 = vpop.f32.mrf.mxu0 }
0x12ff   : > { %v1220_v26 = vpop.xlane.xlu0 %1219 }
0x1300   : > { %v1221_v27 = vmul.f32 0.0625, %v1220_v26 }
0x1302   : > { %v1222_v28 = vsub.f32 %v1215_v22, %v1221_v27  ;;  %v2364_v22 = vld [vmem:[#allocation9 + $0x98] sm:$0xff]  }
0x1304   : > { %v1223_v29 = vmul.f32 %v1222_v28, %v1222_v28 }
0x1306   : > { %v1224_v30 = vsel %vm1042_vm8, %v1223_v29, 0.0 }
0x1307   : > { %1225 = vadd.xlane.f32.xlu0 %v1224_v30 }
0x1390   : > { %v1226_v32 = vpop.xlane.xlu0 %1225 }
0x1391   : > { %v1227_v33 = vmul.f32 0.0625, %v1226_v32 }
0x1393   : > { %v1228_v34 = vadd.f32 1e-05, %v1227_v33 }
0x1395   : > { %2393 = vrsqrt.f32 %v1228_v34 }
0x13a2   : > { %v2394_v35 = vpop.eup %2393 }
0x13a3   : > { %v1230_v37 = vmul.f32 %v2394_v35, %v1222_v28  ;;  %v2013_v28 = vld [vmem:[#allocation8 + $0x14] ss:$0 sm:$0xff] }
0x13a5   : > { %v1235_v39 = vmul.f32 %v2000_v36, %v1230_v37 }
0x13a7   : > { %v1240_v40 = vadd.f32 %v2001_v38, %v1235_v39 }
0x13a9   : > { %1241 = vst.msk [vmem:[#allocation2] sm:$0xf] %vm1042_vm8, %v1240_v40 }
0x13b0   : > { %v1243_v41 = vld [vmem:[#allocation2 + $0x1] ss:$2 sm:$0x3]  ;;  %v1242_v44 = vld [vmem:[#allocation2] ss:$2 sm:$0x3] }
0x13b1   : > { %v1249_v43 = vpack.c.bf16 %v1243_v41, %v1243_v41  ;;  %v1246_v45 = vpack.c.bf16 %v1242_v44, %v1242_v44  ;;  %v2365_v41 = vld [vmem:[#allocation9 + $0xb0] sm:$0xff]  }
0x13b3   : > { %2199 = vmatmul.mubr.msk.bf16.vlgmr.msra.gmra.mxu1 %vm828_vm4, %v1249_v43 }
0x13b4   : > { %2203 = vmatpush3.bf16.msra.mxu1 %v2360_v42  ;;  %2204 = vmatprep.mubr.msk.bf16.mxu1 %vm2594_vm0, %v2593_v0  ;;  %v2366_v42 = vld [vmem:[#allocation9 + $0xa8] sm:$0xff]  }
0x13b5   : > { %2216 = vmatprep.subr.bf16.mxu1 %v2593_v0 }
0x13bb   : > { %2205 = vmatmul.mubr.msk.bf16.vlgmr.msra.gmra.mxu1 %vm828_vm4, %v1246_v45 }
0x13bc   : > { %2218 = vmatprep.mubr.msk.bf16.mxu1 %vm2594_vm0, %v2593_v0 }
0x1473   : > { %v1293_v48 = vpop.f32.mrf.mxu1 }
0x1475   : > { %v2200_v49 = vpop.f32.mrf.mxu1 }
0x1476   : > { %v2018_v49 = vld [vmem:[#allocation8 + $0x16] ss:$0 sm:$0xff] }
0x1477   : > { %v1296_v50 = vpop.f32.mrf.mxu1 }
0x1479   : > { %v2201_v51 = vpop.f32.mrf.mxu1 }
0x147b   : > { %v1342_v52 = vpop.f32.mrf.mxu1 }
0x147c   : > { %v1343_v54 = vadd.f32 %v1342_v52, %v1293_v48 }
0x147d   : > { %v2206_v55 = vpop.f32.mrf.mxu1 }
0x147e   : > { %v2870_v56 = vadd.f32 %v2006_v53, %v1343_v54  ;;  %v2367_v53 = vld [vmem:[#allocation9 + $0xf0] sm:$0xff]   ;;  %v2368_v54 = vld [vmem:[#allocation9 + $0xe8] sm:$0xff]   ;;  %v2369_v55 = vld [vmem:[#allocation9 + $0xe0] sm:$0xff]  }
0x147f   : > { %v1345_v57 = vpop.f32.mrf.mxu1 }
0x1480   : > { %v1358_v58 = vpack.c.bf16 %v2870_v56, %v2870_v56  ;;  %v2371_v57 = vld [vmem:[#allocation9 + $0xd0] sm:$0xff]  }
0x1481   : > { %v2207_v59 = vpop.f32.mrf.mxu1 }
0x1482   : > { %2213 = vmatmul.mubr.msk.bf16.vlgmr.msra.gmra.mxu0 %vm638_vm3, %v1358_v58  ;;  %v2372_v58 = vld [vmem:[#allocation9 + $0xc8] sm:$0xff]   ;;  %v2373_v59 = vld [vmem:[#allocation9 + $0xc0] sm:$0xff]  }
0x1483   : > { %2224 = vmatprep.mubr.msk.bf16.mxu0 %vm2594_vm0, %v2593_v0 }
0x1542   : > { %v1413_v61 = vpop.f32.mrf.mxu0 }
0x1543   : > { %v1414_v62 = vadd.f32 %v2007_v60, %v1413_v61  ;;  %v2374_v60 = vld [vmem:[#allocation9 + $0xb8] sm:$0xff]   ;;  %v2019_v61 = vld [vmem:[#allocation8 + $0x17] ss:$0 sm:$0xff] }
0x1544   : > { %v2214_v63 = vpop.f32.mrf.mxu0 }
0x1545   : > { %v1419_v1 = vpack.c.bf16 %v1414_v62, %v1414_v62 }
0x1546   : > { %v1416_v2 = vpop.f32.mrf.mxu0 }
0x1547   : > { %1421 = vrot.lane.b32.xlu0 %v1419_v1, %s2597_s10 }
0x1548   : > { %v2215_v3 = vpop.f32.mrf.mxu0 }
0x15b9   : > { %v1422_v4 = vpop.permute.xlu0 %1421 }
0x15ba   : > { %v1427_v5 = vsel %vm638_vm3, %v1422_v4, 0  ;;  %v1487_v6 = vsel %vm1486_vm10, %v1422_v4, 0 }
0x15bb   : > { %2217 = vmatpush3.bf16.xpose.msra.mxu1 %v1427_v5  ;;  %2223 = vmatpush3.bf16.msra.mxu0 %v1487_v6 }
0x15bc   : > { %2228 = vmatprep.subr.bf16.mxu1 %v2593_v0  ;;  %2236 = vmatprep.subr.bf16.mxu0 %v2593_v0 }
0x15c2   : > { %2219 = vmatmul.mubr.msk.bf16.vlgmr.msra.gmra.mxu1 %vm638_vm3, %v1419_v1 }
0x15c3   : > { %2232 = vmatprep.mubr.msk.bf16.mxu1 %vm2594_vm0, %v2593_v0  ;;  %2229 = vmatpush3.bf16.msra.mxu1 %v2363_v17 }
0x15c4   : > { %2230 = vmatprep.subr.bf16.mxu1 %v2593_v0 }
0x15c7   : > { %2231 = vmatpush3.bf16.msra.mxu1 %v2364_v22 }
0x15c8   : > { %2244 = vmatprep.subr.bf16.mxu1 %v2593_v0 }
0x1682   : > { %v1463_v7 = vpop.f32.mrf.mxu1 }
0x1683   : > { %v1470_v8 = vsel %vm1469_vm11, %v1463_v7, -inf }
0x1684   : > { %1471 = vmax.xlane.f32.xlu1 %v1470_v8  ;;  %v2220_v9 = vpop.f32.mrf.mxu1 }
0x1686   : > { %v1466_v10 = vpop.f32.mrf.mxu1 }
0x1688   : > { %v2221_v11 = vpop.f32.mrf.mxu1 }
0x170d   : > { %v1472_v12 = vpop.xlane.xlu1 %1471 }
0x170e   : > { %v1473_v13 = vsub.f32 %v1463_v7, %v1472_v12 }
0x1710   : > { %v1474_v14 = vmul.f32 1.442695, %v1473_v13 }
0x1712   : > { %2395 = vpow2.f32 %v1474_v14 }
0x171f   : > { %v2396_v15 = vpop.eup %2395 }
0x1720   : > { %v1476_v16 = vsel %vm1469_vm11, %v2396_v15, 0.0 }
0x1721   : > { %1477 = vadd.xlane.f32.xlu0 %v1476_v16 }
0x17aa   : > { %v1478_v18 = vpop.xlane.xlu0 %1477 }
0x17ab   : > { %2397 = vrcp.f32 %v1478_v18 }
0x17b8   : > { %v2398_v19 = vpop.eup %2397 }
0x17b9   : > { %v1480_v20 = vmul.f32 %v2398_v19, %v2396_v15 }
0x17bb   : > { %v1481_v21 = vpack.c.bf16 %v1480_v20, %v1480_v20 }
0x17bd   : > { %2225 = vmatmul.mubr.msk.bf16.vlgmr.msra.gmra.mxu0 %vm1482_vm12, %v1481_v21 }
0x17be   : > { %2240 = vmatprep.mubr.msk.bf16.mxu0 %vm2594_vm0, %v2593_v0  ;;  %2237 = vmatpush3.bf16.msra.mxu0 %v2365_v41 }
0x17bf   : > { %2238 = vmatprep.subr.bf16.mxu0 %v2593_v0 }
0x17c2   : > { %2239 = vmatpush3.bf16.msra.mxu0 %v2366_v42 }
0x187d   : > { %v1523_v23 = vpop.f32.mrf.mxu0 }
0x187e   : > { %v1533_v24 = vpack.c.bf16 %v1523_v23, %v1523_v23 }
0x187f   : > { %v2226_v25 = vpop.f32.mrf.mxu0 }
0x1880   : > { %2233 = vmatmul.mubr.msk.bf16.vlgmr.msra.gmra.mxu1 %vm638_vm3, %v1533_v24 }
0x1881   : > { %v1526_v26 = vpop.f32.mrf.mxu0  ;;  %2260 = vmatprep.mubr.msk.bf16.mxu1 %vm2594_vm0, %v2593_v0  ;;  %2245 = vmatpush3.bf16.msra.mxu1 %v2367_v53 }
0x1882   : > { %2246 = vmatprep.subr.bf16.mxu1 %v2593_v0 }
0x1883   : > { %v2227_v27 = vpop.f32.mrf.mxu0 }
0x1885   : > { %2247 = vmatpush3.bf16.msra.mxu1 %v2368_v54 }
0x1886   : > { %2248 = vmatprep.subr.bf16.mxu1 %v2593_v0 }
0x1889   : > { %2249 = vmatpush3.bf16.msra.mxu1 %v2369_v55 }
0x188a   : > { %2250 = vmatprep.subr.bf16.mxu1 %v2593_v0 }
0x1940   : > { %v1588_v29 = vpop.f32.mrf.mxu1 }
0x1941   : > { %v1589_v30 = vadd.f32 %v2013_v28, %v1588_v29 }
0x1942   : > { %v2234_v31 = vpop.f32.mrf.mxu1 }
0x1943   : > { %v1594_v32 = vadd.f32 %v1589_v30, %v2870_v56  ;;  %v2370_v56 = vld [vmem:[#allocation9 + $0xd8] sm:$0xff]  }
0x1944   : > { %v1591_v33 = vpop.f32.mrf.mxu1  ;;  %2251 = vmatpush3.bf16.msra.mxu1 %v2370_v56  ;;  %v2032_v30 = vld [vmem:[#allocation8 + $0x19] ss:$0 sm:$0xff] }
0x1945   : > { %v1598_v34 = vsel %vm1597_vm13, %v1594_v32, 0.0  ;;  %2252 = vmatprep.subr.bf16.mxu1 %v2593_v0 }
0x1946   : > { %1599 = vadd.xlane.f32.xlu1 %v1598_v34  ;;  %v2235_v35 = vpop.f32.mrf.mxu1 }
0x1948   : > { %2253 = vmatpush3.bf16.msra.mxu1 %v2371_v57 }
0x1949   : > { %2254 = vmatprep.subr.bf16.mxu1 %v2593_v0 }
0x194c   : > { %2255 = vmatpush3.bf16.msra.mxu1 %v2372_v58 }
0x194d   : > { %2256 = vmatprep.subr.bf16.mxu1 %v2593_v0 }
0x1950   : > { %2257 = vmatpush3.bf16.msra.mxu1 %v2373_v59 }
0x1951   : > { %2258 = vmatprep.subr.bf16.mxu1 %v2593_v0  ;;  %v2023_v0 = vld [vmem:[#allocation8 + $0x18] ss:$0 sm:$0xff] }
0x1954   : > { %2259 = vmatpush3.bf16.msra.mxu1 %v2374_v60 }
0x19cf   : > { %v1600_v36 = vpop.xlane.xlu1 %1599 }
0x19d0   : > { %v1602_v37 = vmul.f32 0.03125, %v1600_v36 }
0x19d2   : > { %v1603_v38 = vsub.f32 %v1594_v32, %v1602_v37  ;;  %v2033_v32 = vld [vmem:[#allocation8 + $0x1a] ss:$0 sm:$0xff] }
0x19d4   : > { %v1604_v39 = vmul.f32 %v1603_v38, %v1603_v38 }
0x19d6   : > { %v1605_v40 = vsel %vm1597_vm13, %v1604_v39, 0.0 }
0x19d7   : > { %1606 = vadd.xlane.f32.xlu1 %v1605_v40 }
0x1a60   : > { %v1607_v43 = vpop.xlane.xlu1 %1606 }
0x1a61   : > { %v1608_v44 = vmul.f32 0.03125, %v1607_v43 }
0x1a63   : > { %v1609_v45 = vadd.f32 1e-05, %v1608_v44 }
0x1a65   : > { %2399 = vrsqrt.f32 %v1609_v45 }
0x1a72   : > { %v2400_v46 = vpop.eup %2399 }
0x1a73   : > { %v1611_v48 = vmul.f32 %v2400_v46, %v1603_v38 }
0x1a75   : > { %v1616_v50 = vmul.f32 %v2017_v47, %v1611_v48 }
0x1a77   : > { %v1621_v51 = vadd.f32 %v2018_v49, %v1616_v50 }
0x1a79   : > { %v1626_v52 = vpack.c.bf16 %v1621_v51, %v1621_v51 }
0x1a7b   : > { %2241 = vmatmul.mubr.msk.bf16.vlgmr.msra.gmra.mxu0 %vm638_vm3, %v1626_v52 }
0x1b3b   : > { %v1681_v62 = vpop.f32.mrf.mxu0 }
0x1b3c   : > { %v1682_v63 = vadd.f32 %v2019_v61, %v1681_v62 }
0x1b3d   : > { %v2242_v1 = vpop.f32.mrf.mxu0 }
0x1b3e   : > { %v1688_v2 = vmul.f32 0.044715, %v1682_v63  ;;  %v1687_v10 = vmul.f32 0.5, %v1682_v63 }
0x1b3f   : > { %v1684_v3 = vpop.f32.mrf.mxu0 }
0x1b40   : > { %v1689_v4 = vmul.f32 %v1688_v2, %v1682_v63 }
0x1b41   : > { %v2243_v5 = vpop.f32.mrf.mxu0 }
0x1b42   : > { %v1690_v6 = vmul.f32 %v1689_v4, %v1682_v63 }
0x1b44   : > { %v1691_v7 = vadd.f32 %v1690_v6, %v1682_v63 }
0x1b46   : > { %v1692_v8 = vmul.f32 0.7978846, %v1691_v7 }
0x1b48   : > { %2401 = vtanh.f32 %v1692_v8 }
0x1b55   : > { %v2402_v9 = vpop.eup %2401 }
0x1b56   : > { %v1694_v11 = vadd.f32 1.0, %v2402_v9 }
0x1b58   : > { %v1695_v12 = vmul.f32 %v1694_v11, %v1687_v10 }
0x1b5a   : > { %v1712_v13 = vpack.c.bf16 %v1695_v12, %v1695_v12 }
0x1b5c   : > { %2261 = vmatmul.mubr.bf16.vlgmr.msra.gmra.mxu1 %v1712_v13 }
0x1c1c   : > { %v1800_v14 = vpop.f32.mrf.mxu1 }
0x1c1d   : > { %v1801_v15 = vadd.f32 %v2023_v0, %v1800_v14 }
0x1c1e   : > { %v2262_v16 = vpop.f32.mrf.mxu1 }
0x1c1f   : > { %v1806_v17 = vadd.f32 %v1801_v15, %v1621_v51 }
0x1c20   : > { %v1803_v18 = vpop.f32.mrf.mxu1 }
0x1c21   : > { %v1809_v19 = vsel %vm1597_vm13, %v1806_v17, 0.0 }
0x1c22   : > { %1810 = vadd.xlane.f32.xlu1 %v1809_v19  ;;  %v2263_v20 = vpop.f32.mrf.mxu1 }
0x1cab   : > { %v1811_v21 = vpop.xlane.xlu1 %1810 }
0x1cac   : > { %v1812_v22 = vmul.f32 0.03125, %v1811_v21 }
0x1cae   : > { %v1813_v23 = vsub.f32 %v1806_v17, %v1812_v22 }
0x1cb0   : > { %v1814_v24 = vmul.f32 %v1813_v23, %v1813_v23 }
0x1cb2   : > { %v1815_v25 = vsel %vm1597_vm13, %v1814_v24, 0.0 }
0x1cb3   : > { %1816 = vadd.xlane.f32.xlu1 %v1815_v25 }
0x1d3c   : > { %v1817_v26 = vpop.xlane.xlu1 %1816 }
0x1d3d   : > { %v1818_v27 = vmul.f32 0.03125, %v1817_v26 }
0x1d3f   : > { %v1819_v28 = vadd.f32 1e-05, %v1818_v27 }
0x1d41   : > { %2403 = vrsqrt.f32 %v1819_v28 }
0x1d4e   : > { %v2404_v29 = vpop.eup %2403 }
0x1d4f   : > { %v1821_v31 = vmul.f32 %v2404_v29, %v1813_v23 }
0x1d51   : > { %v1826_v33 = vmul.f32 %v2032_v30, %v1821_v31 }
0x1d53   : > { %v1831_v34 = vadd.f32 %v2033_v32, %v1826_v33 }
0x1d55   : > { %1832 = vst.msk [vmem:[%s254_s14] sm:$0x3] %vm1597_vm13, %v1831_v34 }
0x1d56   : > { %2524 = shalt.err (!%p2521_p3)
}
0x1d57   : > { %s2525_s24 = scalar_lea.hbm %s1845_s30, 32  ;;  %s2529_s21 = scalar_lea.hbm %s2945_s4, 64 }
0x1d58   : > { %p2526_p5 = scmp.ne.s32.totalorder %s1845_s30, %s2525_s24  ;;  %p2530_p11 = scmp.lt.s32.totalorder %s1845_s30, %s2945_s4 }
0x1d59   : > { %p2531_p4 = scmp.lt.s32.totalorder %s2529_s21, %s2525_s24 }
0x1d5a   : > { %p2527_p2 = pnand %p2526_p5, %p2963_p12 }
0x1d5b   : > { %p2532_p6 = por %p2531_p4, %p2530_p11 }
0x1d5c   : > { %p2528_p9 = pneg %p2527_p2 }
0x1d5e   : > { %p2533_p8 = pnand %p2532_p6, %p2528_p9 }
0x1d60   : > { %2536 = shalt.err (!%p2533_p8)
}
0x1d61   : > { %2278 = dma.vmem_to_hbm [thread:$0]  (%p2963_p12), %s1848_s27, 32, %s1845_s30, %s1834_s28  }
0x1d62 PF: > { %s1859_s12 = sand.u32 1, %s2571_s15   ;;  %p2964_p7 = scmp.ne.s32.totalorder %s2951_s22, 0 }
0x1d63   : > { %p2965_p10 = scmp.ge.s32.totalorder %s2583_s18, 2  ;;  %s1860_s13 = scalar_lea.sflag [#allocation5], %s1859_s12 }
0x1d65   : > { %p2295_p13 = pnand %p2965_p10, %p2964_p7 }
0x1d67   : > { %p2296_p0 = pneg %p2295_p13 }
0x1d69   : > { %2566 = dma.done.wait (%p2296_p0), %s1860_s13, 32  }
0x1d6a   : > { %2568 = vsyncadd (%p2296_p0), %s1860_s13, 4294967264  ;;  %p19_p1 = scmp.ge.s32.totalorder %s2704_s26, 4   ;;  %s2966_s15 = smov %s2575_s16 }
0x1d6b   : > { %s2967_s16 = smov %s2579_s17  ;;  %s2968_s17 = smov %s2714_s5 }
0x1d6c   : > { %s2969_s18 = smov %s2704_s26  ;;  %21 = sbr.rel (!%p19_p1) target bundleno = 7 (0x7), region = 94 }
0x1d71   :  { %1865 = vsyncpa [#allocation4], 1 }
0x1d72   :  { %1867 = vsyncpa [#allocation4 + $0x1], 1 }
0x1d73   :  { %1868 = vsyncpa [#allocation7], 1 }
0x1d74   :  { %1869 = vsyncpa [#allocation10], 1 }
0x1d75   :  { %1870 = vsyncpa [#allocation5], 1 }
0x1d76   :  { %1872 = vsyncpa [#allocation5 + $0x1], 1 }

</bundles_post_ra>
